<compile_context>
chip_gen: v7x
topology: tpu7x:2x2x1
jax: 0.10.0
libtpu: 0.0.40
codegen_flags: <defaults>
</compile_context>

<pallas_src>
import math

import jax
import jax.numpy as jnp
from jax.experimental import pallas as pl
from jax.experimental.pallas import tpu as pltpu

LOG2 = math.log(2.0)

N_FILTERS = 64             # logical feature width (as in the PyTorch module)
F_PAD = 128                # padded feature width (lane-dense)
N_INTERACTIONS = 2
U_MAX = 5.0
GAMMA = 10.0
STEP = 0.1
N_RBF = int(U_MAX / STEP)  # 50 gaussian centers
R_PAD = 128                # padded RBF width (lane-dense)
OUTPUT_DIM = 1
E_BLK = 128                # edge-block tile


def _round_up(x, m):
    return ((x + m - 1) // m) * m


def _ssp(y):
    # shifted softplus from guaranteed-lowerable elementwise ops (f32, EUP)
    return jnp.maximum(y, 0.0) + jnp.log(1.0 + jnp.exp(-jnp.abs(y))) - LOG2


# ----------------------------------------------------------------------------
# Fully fused SchNet core kernel.
#   grid = (layer, edge_block), both "arbitrary".
#   x_scr  : f32 node features, carried across layers (residual stream)
#   m_scr  : bf16 lin_1(x) for the current layer (gather source)
#   acc_scr: f32 scatter-sum accumulator for the current layer
# ----------------------------------------------------------------------------
def _schnet_core_kernel(x_ref, rbf_ref, gat_ref, scat_ref,
                        l1w, l1b, f1w, f1b, f2w, f2b,
                        m1w, m1b, m2w, m2b,
                        pw1, pb1, pw2, pb2,
                        o_ref, x_scr, m_scr, acc_scr):
    layer = pl.program_id(0)
    eb = pl.program_id(1)
    last_layer = pl.num_programs(0) - 1
    last_eb = pl.num_programs(1) - 1

    @pl.when(jnp.logical_and(layer == 0, eb == 0))
    def _():
        x_scr[...] = x_ref[...]

    # --- layer prologue: m = lin_1(x), zero the scatter accumulator ---------
    @pl.when(eb == 0)
    def _():
        m = jnp.dot(x_scr[...].astype(jnp.bfloat16), l1w[0],
                    preferred_element_type=jnp.float32) + l1b[0]
        m_scr[...] = m.astype(jnp.bfloat16)
        acc_scr[...] = jnp.zeros_like(acc_scr)

    # --- per-edge-block CFConv body ------------------------------------------
    # gather source-node features (one-hot matmul on the MXU)
    xj = jnp.dot(gat_ref[...], m_scr[...], preferred_element_type=jnp.float32)
    # filter-generating network
    h = jnp.dot(rbf_ref[...], f1w[0], preferred_element_type=jnp.float32)
    h = _ssp(h + f1b[0])
    w = jnp.dot(h.astype(jnp.bfloat16), f2w[0],
                preferred_element_type=jnp.float32) + f2b[0]
    msg = (xj * w).astype(jnp.bfloat16)                          # (E_blk, F)
    # scatter-sum messages to destination nodes (one-hot matmul on the MXU)
    acc_scr[...] += jnp.dot(scat_ref[...], msg,
                            preferred_element_type=jnp.float32)

    # --- layer epilogue: v = mlp(acc); x += v --------------------------------
    @pl.when(eb == last_eb)
    def _():
        v = acc_scr[...]
        v = _ssp(jnp.dot(v.astype(jnp.bfloat16), m1w[0],
                         preferred_element_type=jnp.float32) + m1b[0])
        v = jnp.dot(v.astype(jnp.bfloat16), m2w[0],
                    preferred_element_type=jnp.float32) + m2b[0]
        x_scr[...] = x_scr[...] + v

    # --- final epilogue: fused post_mlp and single lane-dense store ----------
    @pl.when(jnp.logical_and(layer == last_layer, eb == last_eb))
    def _():
        h2 = _ssp(jnp.dot(x_scr[...].astype(jnp.bfloat16), pw1[...],
                          preferred_element_type=jnp.float32) + pb1[...])
        y = jnp.dot(h2.astype(jnp.bfloat16), pw2[...],
                    preferred_element_type=jnp.float32) + pb2[...]
        o_ref[...] = y.astype(o_ref.dtype)


def schnet_core(x, rbf, gat, scat, ip, pm):
    n_pad, f = x.shape
    e_pad = rbf.shape[0]
    n_eb = e_pad // E_BLK
    n_layers = ip["l1w"].shape[0]

    def rep(shape):
        return pl.BlockSpec(shape, lambda l, eb: (0, 0))

    def per_layer(shape):
        return pl.BlockSpec(shape, lambda l, eb: (l, 0, 0))

    return pl.pallas_call(
        _schnet_core_kernel,
        out_shape=jax.ShapeDtypeStruct((n_pad, f), jnp.float32),
        grid_spec=pltpu.PrefetchScalarGridSpec(
            num_scalar_prefetch=0,
            grid=(n_layers, n_eb),
            in_specs=[
                rep((n_pad, f)),                                       # x0
                pl.BlockSpec((E_BLK, R_PAD), lambda l, eb: (eb, 0)),   # rbf
                pl.BlockSpec((E_BLK, n_pad), lambda l, eb: (eb, 0)),   # gather
                pl.BlockSpec((n_pad, E_BLK), lambda l, eb: (0, eb)),   # scatter
                per_layer((1, f, f)), per_layer((1, 1, f)),            # lin_1
                per_layer((1, R_PAD, f)), per_layer((1, 1, f)),        # filt W1
                per_layer((1, f, f)), per_layer((1, 1, f)),            # filt W2
                per_layer((1, f, f)), per_layer((1, 1, f)),            # mlp W1
                per_layer((1, f, f)), per_layer((1, 1, f)),            # mlp W2
                rep((f, f)), rep((1, f)),                              # post W1
                rep((f, f)), rep((1, f)),                              # post W2
            ],
            out_specs=pl.BlockSpec((n_pad, f), lambda l, eb: (0, 0)),
            scratch_shapes=[pltpu.VMEM((n_pad, f), jnp.float32),    # x carry
                            pltpu.VMEM((n_pad, f), jnp.bfloat16),   # lin_1(x)
                            pltpu.VMEM((n_pad, f), jnp.float32)],   # scatter acc
        ),
        compiler_params=pltpu.CompilerParams(
            dimension_semantics=("arbitrary", "arbitrary"),
            vmem_limit_bytes=32 * 1024 * 1024),
    )(x, rbf, gat, scat,
      ip["l1w"], ip["l1b"], ip["f1w"], ip["f1b"], ip["f2w"], ip["f2b"],
      ip["m1w"], ip["m1b"], ip["m2w"], ip["m2b"],
      pm["w1"], pm["b1"], pm["w2"], pm["b2"])


# ----------------------------------------------------------------------------
# Parameter construction: Pallas-side weights stored pre-transposed (in, out),
# zero-padded to (in_pad, out_pad), bf16; biases (1, out_pad) f32.
# Zero padding + SSPlus(0)=0 keeps padded feature channels exactly zero.
# ----------------------------------------------------------------------------
def _pallas_linear_params(key, in_dim, out_dim, in_pad, out_pad):
    kw, kb = jax.random.split(key)
    w = jax.random.normal(kw, (in_dim, out_dim), jnp.float32) * 0.1
    b = jax.random.normal(kb, (out_dim,), jnp.float32) * 0.01
    wp = jnp.zeros((in_pad, out_pad), jnp.float32).at[:in_dim, :out_dim].set(w)
    bp = jnp.zeros((1, out_pad), jnp.float32).at[0, :out_dim].set(b)
    return wp.astype(jnp.bfloat16), bp


def _jax_linear_params(key, in_dim, out_dim):
    kw, kb = jax.random.split(key)
    w = jax.random.normal(kw, (in_dim, out_dim), jnp.float32) * 0.1
    b = jax.random.normal(kb, (out_dim,), jnp.float32) * 0.01
    return w, b


def init_params(key):
    keys = iter(jax.random.split(key, 64))
    p = {}
    emb = jax.random.normal(next(keys), (100, N_FILTERS), jnp.float32) * 0.1
    emb = emb.at[0].set(0.0)                              # padding_idx=0
    p["emb_z"] = jnp.zeros((100, F_PAD), jnp.float32).at[:, :N_FILTERS].set(emb)
    p["emb_solv"] = jax.random.normal(next(keys), (4, 64), jnp.float32) * 0.1
    p["mlp_solv"] = [_jax_linear_params(next(keys), 64, 64),
                     _jax_linear_params(next(keys), 64, 32)]

    # per-interaction-layer weights, stacked with a leading layer axis
    layers = []
    for _ in range(N_INTERACTIONS):
        layers.append(dict(
            l1=_pallas_linear_params(next(keys), N_FILTERS, N_FILTERS, F_PAD, F_PAD),
            f1=_pallas_linear_params(next(keys), N_RBF, N_FILTERS, R_PAD, F_PAD),
            f2=_pallas_linear_params(next(keys), N_FILTERS, N_FILTERS, F_PAD, F_PAD),
            m1=_pallas_linear_params(next(keys), N_FILTERS, N_FILTERS, F_PAD, F_PAD),
            m2=_pallas_linear_params(next(keys), N_FILTERS, N_FILTERS, F_PAD, F_PAD),
        ))
    ip = {}
    for name in ("l1", "f1", "f2", "m1", "m2"):
        ip[name + "w"] = jnp.stack([lay[name][0] for lay in layers])  # (L,in,out) bf16
        ip[name + "b"] = jnp.stack([lay[name][1] for lay in layers])  # (L,1,out) f32
    p["int"] = ip

    pw1, pb1 = _pallas_linear_params(next(keys), N_FILTERS, N_FILTERS, F_PAD, F_PAD)
    pw2, pb2 = _pallas_linear_params(next(keys), N_FILTERS, 64, F_PAD, F_PAD)
    p["post_mlp"] = dict(w1=pw1, b1=pb1, w2=pw2, b2=pb2)
    p["post_mlp2"] = [_jax_linear_params(next(keys), 64 + 32, 128),
                      _jax_linear_params(next(keys), 128, 32),
                      _jax_linear_params(next(keys), 32, OUTPUT_DIM)]
    p["mu"] = jnp.arange(N_RBF, dtype=jnp.float32).reshape(1, N_RBF) * STEP
    return p


# ----------------------------------------------------------------------------
# Forward pass: all node/edge hot work in ONE fused Pallas kernel; tiny
# graph-level MLPs, embeddings and geometry glue stay in plain jnp under jit.
# ----------------------------------------------------------------------------
def schnet_nuc_forward(params, z, position, edge_index, solvent, nuc_index):
    row, col = edge_index[0], edge_index[1]        # messages flow col -> row
    n = z.shape[0]
    e = row.shape[0]
    n_pad = _round_up(n, 16)
    e_pad = _round_up(max(e, 1), E_BLK)

    # ---- node embedding (padded nodes use padding_idx=0 => zero row) -------
    z_pad = jnp.zeros((n_pad,), z.dtype).at[:n].set(z)
    x = params["emb_z"][z_pad]                                    # (n_pad, 128)

    # ---- graph-level solvent MLP: tiny, plain jnp --------------------------
    (sw1, sb1), (sw2, sb2) = params["mlp_solv"]
    solv = params["emb_solv"][solvent]
    solv = _ssp(solv @ sw1 + sb1) @ sw2 + sb2                     # (G, 32)

    # ---- edge geometry, computed ONCE and reused by both interactions ------
    diff = position[row] - position[col]
    d = jnp.sqrt(jnp.sum(diff * diff, axis=-1, keepdims=True))    # (E, 1)
    rbf = jnp.exp(-GAMMA * (d - params["mu"]) ** 2)               # (E, 50)
    rbf_p = (jnp.zeros((e_pad, R_PAD), jnp.float32)
             .at[:e, :N_RBF].set(rbf)).astype(jnp.bfloat16)
    # padded edge slots point to -1 => match no node => zero rows/cols
    row_p = jnp.full((e_pad,), -1, jnp.int32).at[:e].set(row)
    col_p = jnp.full((e_pad,), -1, jnp.int32).at[:e].set(col)
    node_ids = jnp.arange(n_pad, dtype=jnp.int32)
    gat = (col_p[:, None] == node_ids[None, :]).astype(jnp.bfloat16)   # (E_pad, N_pad)
    scat = (node_ids[:, None] == row_p[None, :]).astype(jnp.bfloat16)  # (N_pad, E_pad)

    # ---- single fused Pallas kernel: 2x Interaction + post_mlp -------------
    x = schnet_core(x, rbf_p, gat, scat, params["int"], params["post_mlp"])

    # ---- nucleophile readout + graph-level head (tiny, plain jnp) ----------
    xn = x[nuc_index - 1, :64]                                    # (G, 64)
    out = jnp.concatenate([xn, solv], axis=1)                     # (G, 96)
    (w1, b1), (w2, b2), (w3, b3) = params["post_mlp2"]
    out = _ssp(out @ w1 + b1)
    out = _ssp(out @ w2 + b2)
    out = out @ w3 + b3                                           # (G, 1)
    return out


# ----------------------------------------------------------------------------
# Demo
# ----------------------------------------------------------------------------
if __name__ == "__main__":
    key = jax.random.PRNGKey(0)
    kp, kz, kpos, ksolv = jax.random.split(key, 4)

    params = init_params(kp)

    # 2 graphs of 8 atoms each (16 nodes total)
    n_per_graph, n_graphs = 8, 2
    n_nodes = n_per_graph * n_graphs
    z = jax.random.randint(kz, (n_nodes,), 1, 10, dtype=jnp.int32)
    position = jax.random.normal(kpos, (n_nodes, 3), jnp.float32) * 2.0

    # bidirectional chain edges inside each graph
    rows, cols = [], []
    for g in range(n_graphs):
        off = g * n_per_graph
        for k in range(n_per_graph - 1):
            rows += [off + k, off + k + 1]
            cols += [off + k + 1, off + k]
    edge_index = jnp.array([rows, cols], dtype=jnp.int32)          # (2, 28)

    solvent = jax.random.randint(ksolv, (n_graphs,), 0, 4, dtype=jnp.int32)
    nuc_index = jnp.array([3, 11], dtype=jnp.int32)                # 1-based

    fwd = jax.jit(schnet_nuc_forward)
    out = fwd(params, z, position, edge_index, solvent, nuc_index)
    out = jax.block_until_ready(out)

    assert out.shape == (n_graphs, OUTPUT_DIM), out.shape
    assert bool(jnp.all(jnp.isfinite(out)))
    print("KERNEL_OK")
</pallas_src>

<mosaic_0001>
module attributes {stable_mosaic.version = 11 : i64} {
  func.func @_schnet_core_kernel(%arg0: i32, %arg1: i32, %arg2: memref<16x128xf32, #tpu.memory_space<vmem>>, %arg3: memref<128x128xbf16, #tpu.memory_space<vmem>>, %arg4: memref<128x16xbf16, #tpu.memory_space<vmem>>, %arg5: memref<16x128xbf16, #tpu.memory_space<vmem>>, %arg6: memref<1x128x128xbf16, #tpu.memory_space<vmem>>, %arg7: memref<1x1x128xf32, #tpu.memory_space<vmem>>, %arg8: memref<1x128x128xbf16, #tpu.memory_space<vmem>>, %arg9: memref<1x1x128xf32, #tpu.memory_space<vmem>>, %arg10: memref<1x128x128xbf16, #tpu.memory_space<vmem>>, %arg11: memref<1x1x128xf32, #tpu.memory_space<vmem>>, %arg12: memref<1x128x128xbf16, #tpu.memory_space<vmem>>, %arg13: memref<1x1x128xf32, #tpu.memory_space<vmem>>, %arg14: memref<1x128x128xbf16, #tpu.memory_space<vmem>>, %arg15: memref<1x1x128xf32, #tpu.memory_space<vmem>>, %arg16: memref<128x128xbf16, #tpu.memory_space<vmem>>, %arg17: memref<1x128xf32, #tpu.memory_space<vmem>>, %arg18: memref<128x128xbf16, #tpu.memory_space<vmem>>, %arg19: memref<1x128xf32, #tpu.memory_space<vmem>>, %arg20: memref<16x128xf32, #tpu.memory_space<vmem>>, %arg21: memref<16x128xf32, #tpu.memory_space<vmem>>, %arg22: memref<16x128xbf16, #tpu.memory_space<vmem>>, %arg23: memref<16x128xf32, #tpu.memory_space<vmem>>) attributes {dimension_semantics = [#tpu.dimension_semantics<arbitrary>, #tpu.dimension_semantics<arbitrary>], iteration_bounds = array<i64: 2, 1>, scalar_prefetch = 0 : i64, scratch_operands = 3 : i64, tpu.core_type = #tpu.core_type<tc>, window_params = [{pipeline_mode = #tpu.pipeline_mode<synchronous>, transform_indices = @transform_0, window_bounds = array<i64: 16, 128>}, {transform_indices = @transform_1, window_bounds = array<i64: 128, 128>}, {transform_indices = @transform_2, window_bounds = array<i64: 128, 16>}, {transform_indices = @transform_3, window_bounds = array<i64: 16, 128>}, {transform_indices = @transform_4, window_bounds = array<i64: 1, 128, 128>}, {transform_indices = @transform_5, window_bounds = array<i64: 1, 1, 128>}, {transform_indices = @transform_6, window_bounds = array<i64: 1, 128, 128>}, {transform_indices = @transform_7, window_bounds = array<i64: 1, 1, 128>}, {transform_indices = @transform_8, window_bounds = array<i64: 1, 128, 128>}, {transform_indices = @transform_9, window_bounds = array<i64: 1, 1, 128>}, {transform_indices = @transform_10, window_bounds = array<i64: 1, 128, 128>}, {transform_indices = @transform_11, window_bounds = array<i64: 1, 1, 128>}, {transform_indices = @transform_12, window_bounds = array<i64: 1, 128, 128>}, {transform_indices = @transform_13, window_bounds = array<i64: 1, 1, 128>}, {pipeline_mode = #tpu.pipeline_mode<synchronous>, transform_indices = @transform_14, window_bounds = array<i64: 128, 128>}, {pipeline_mode = #tpu.pipeline_mode<synchronous>, transform_indices = @transform_15, window_bounds = array<i64: 1, 128>}, {pipeline_mode = #tpu.pipeline_mode<synchronous>, transform_indices = @transform_16, window_bounds = array<i64: 128, 128>}, {pipeline_mode = #tpu.pipeline_mode<synchronous>, transform_indices = @transform_17, window_bounds = array<i64: 1, 128>}, {pipeline_mode = #tpu.pipeline_mode<synchronous>, transform_indices = @transform_18, window_bounds = array<i64: 16, 128>}]} {
    %c0_i32 = arith.constant 0 : i32
    %0 = arith.cmpi eq, %arg0, %c0_i32 : i32
    %c0_i32_0 = arith.constant 0 : i32
    %1 = arith.cmpi eq, %arg1, %c0_i32_0 : i32
    %2 = arith.andi %0, %1 : i1
    %3 = arith.extui %2 : i1 to i32
    %c0_i32_1 = arith.constant 0 : i32
    %4 = arith.cmpi ne, %3, %c0_i32_1 : i32
    scf.if %4 {
      %c0_38 = arith.constant 0 : index
      %c0_39 = arith.constant 0 : index
      %54 = vector.load %arg2[%c0_38, %c0_39] : memref<16x128xf32, #tpu.memory_space<vmem>>, vector<16x128xf32>
      %c0_40 = arith.constant 0 : index
      %c0_41 = arith.constant 0 : index
      %55 = vector.load %arg21[%c0_40, %c0_41] : memref<16x128xf32, #tpu.memory_space<vmem>>, vector<16x128xf32>
      tpu.vector_store %arg21[%c0_40, %c0_41], %54 {strides = array<i32>} : memref<16x128xf32, #tpu.memory_space<vmem>>, vector<16x128xf32>,
    } else {
    }
    %c0_i32_2 = arith.constant 0 : i32
    %5 = arith.cmpi eq, %arg1, %c0_i32_2 : i32
    %6 = arith.extui %5 : i1 to i32
    %c0_i32_3 = arith.constant 0 : i32
    %7 = arith.cmpi ne, %6, %c0_i32_3 : i32
    scf.if %7 {
      %c0_38 = arith.constant 0 : index
      %c0_39 = arith.constant 0 : index
      %54 = vector.load %arg21[%c0_38, %c0_39] : memref<16x128xf32, #tpu.memory_space<vmem>>, vector<16x128xf32>
      %55 = arith.truncf %54 : vector<16x128xf32> to vector<16x128xbf16>
      %c0_40 = arith.constant 0 : index
      %c0_41 = arith.constant 0 : index
      %c0_42 = arith.constant 0 : index
      %56 = vector.load %arg6[%c0_40, %c0_41, %c0_42] : memref<1x128x128xbf16, #tpu.memory_space<vmem>>, vector<1x128x128xbf16>
      %57 = vector.shape_cast %56 : vector<1x128x128xbf16> to vector<128x128xbf16>
      %cst_43 = arith.constant dense<0.000000e+00> : vector<16x128xf32>
      %58 = tpu.matmul %55, %57, %cst_43 {dimension_numbers = #tpu.dot_dimension_numbers<[1], [0], [0], [1], [0, 0, 1, 1], [], []>} : vector<16x128xbf16>, vector<128x128xbf16>, vector<16x128xf32> -> vector<16x128xf32>
      %c0_44 = arith.constant 0 : index
      %c0_45 = arith.constant 0 : index
      %c0_46 = arith.constant 0 : index
      %59 = vector.load %arg7[%c0_44, %c0_45, %c0_46] : memref<1x1x128xf32, #tpu.memory_space<vmem>>, vector<1x1x128xf32>
      %60 = vector.shape_cast %59 : vector<1x1x128xf32> to vector<1x128xf32>
      %61 = vector.broadcast %60 : vector<1x128xf32> to vector<16x128xf32>
      %62 = arith.addf %58, %61 : vector<16x128xf32>
      %63 = arith.truncf %62 : vector<16x128xf32> to vector<16x128xbf16>
      %c0_47 = arith.constant 0 : index
      %c0_48 = arith.constant 0 : index
      %64 = vector.load %arg22[%c0_47, %c0_48] : memref<16x128xbf16, #tpu.memory_space<vmem>>, vector<16x128xbf16>
      tpu.vector_store %arg22[%c0_47, %c0_48], %63 {strides = array<i32>} : memref<16x128xbf16, #tpu.memory_space<vmem>>, vector<16x128xbf16>,
      %cst_49 = arith.constant 0.000000e+00 : f32
      %65 = vector.broadcast %cst_49 : f32 to vector<16x128xf32>
      %c0_50 = arith.constant 0 : index
      %c0_51 = arith.constant 0 : index
      %66 = vector.load %arg23[%c0_50, %c0_51] : memref<16x128xf32, #tpu.memory_space<vmem>>, vector<16x128xf32>
      tpu.vector_store %arg23[%c0_50, %c0_51], %65 {strides = array<i32>} : memref<16x128xf32, #tpu.memory_space<vmem>>, vector<16x128xf32>,
    } else {
    }
    %c0 = arith.constant 0 : index
    %c0_4 = arith.constant 0 : index
    %8 = vector.load %arg4[%c0, %c0_4] : memref<128x16xbf16, #tpu.memory_space<vmem>>, vector<128x16xbf16>
    %c0_5 = arith.constant 0 : index
    %c0_6 = arith.constant 0 : index
    %9 = vector.load %arg22[%c0_5, %c0_6] : memref<16x128xbf16, #tpu.memory_space<vmem>>, vector<16x128xbf16>
    %cst = arith.constant dense<0.000000e+00> : vector<128x128xf32>
    %10 = tpu.matmul %8, %9, %cst {dimension_numbers = #tpu.dot_dimension_numbers<[1], [0], [0], [1], [0, 0, 1, 1], [], []>} : vector<128x16xbf16>, vector<16x128xbf16>, vector<128x128xf32> -> vector<128x128xf32>
    %c0_7 = arith.constant 0 : index
    %c0_8 = arith.constant 0 : index
    %11 = vector.load %arg3[%c0_7, %c0_8] : memref<128x128xbf16, #tpu.memory_space<vmem>>, vector<128x128xbf16>
    %c0_9 = arith.constant 0 : index
    %c0_10 = arith.constant 0 : index
    %c0_11 = arith.constant 0 : index
    %12 = vector.load %arg8[%c0_9, %c0_10, %c0_11] : memref<1x128x128xbf16, #tpu.memory_space<vmem>>, vector<1x128x128xbf16>
    %13 = vector.shape_cast %12 : vector<1x128x128xbf16> to vector<128x128xbf16>
    %cst_12 = arith.constant dense<0.000000e+00> : vector<128x128xf32>
    %14 = tpu.matmul %11, %13, %cst_12 {dimension_numbers = #tpu.dot_dimension_numbers<[1], [0], [0], [1], [0, 0, 1, 1], [], []>} : vector<128x128xbf16>, vector<128x128xbf16>, vector<128x128xf32> -> vector<128x128xf32>
    %c0_13 = arith.constant 0 : index
    %c0_14 = arith.constant 0 : index
    %c0_15 = arith.constant 0 : index
    %15 = vector.load %arg9[%c0_13, %c0_14, %c0_15] : memref<1x1x128xf32, #tpu.memory_space<vmem>>, vector<1x1x128xf32>
    %16 = vector.shape_cast %15 : vector<1x1x128xf32> to vector<1x128xf32>
    %17 = vector.broadcast %16 : vector<1x128xf32> to vector<128x128xf32>
    %18 = arith.addf %14, %17 : vector<128x128xf32>
    %cst_16 = arith.constant 0.000000e+00 : f32
    %19 = vector.broadcast %cst_16 : f32 to vector<128x128xf32>
    %20 = arith.maximumf %18, %19 : vector<128x128xf32>
    %21 = math.absf %18 : vector<128x128xf32>
    %cst_17 = arith.constant 0.000000e+00 : f32
    %22 = vector.broadcast %cst_17 : f32 to vector<128x128xf32>
    %23 = arith.subf %22, %21 : vector<128x128xf32>
    %24 = math.exp %23 : vector<128x128xf32>
    %cst_18 = arith.constant 1.000000e+00 : f32
    %25 = vector.broadcast %cst_18 : f32 to vector<128x128xf32>
    %26 = arith.addf %25, %24 : vector<128x128xf32>
    %27 = math.log %26 : vector<128x128xf32>
    %28 = arith.addf %20, %27 : vector<128x128xf32>
    %cst_19 = arith.constant 0.693147182 : f32
    %29 = vector.broadcast %cst_19 : f32 to vector<128x128xf32>
    %30 = arith.subf %28, %29 : vector<128x128xf32>
    %31 = arith.truncf %30 : vector<128x128xf32> to vector<128x128xbf16>
    %c0_20 = arith.constant 0 : index
    %c0_21 = arith.constant 0 : index
    %c0_22 = arith.constant 0 : index
    %32 = vector.load %arg10[%c0_20, %c0_21, %c0_22] : memref<1x128x128xbf16, #tpu.memory_space<vmem>>, vector<1x128x128xbf16>
    %33 = vector.shape_cast %32 : vector<1x128x128xbf16> to vector<128x128xbf16>
    %cst_23 = arith.constant dense<0.000000e+00> : vector<128x128xf32>
    %34 = tpu.matmul %31, %33, %cst_23 {dimension_numbers = #tpu.dot_dimension_numbers<[1], [0], [0], [1], [0, 0, 1, 1], [], []>} : vector<128x128xbf16>, vector<128x128xbf16>, vector<128x128xf32> -> vector<128x128xf32>
    %c0_24 = arith.constant 0 : index
    %c0_25 = arith.constant 0 : index
    %c0_26 = arith.constant 0 : index
    %35 = vector.load %arg11[%c0_24, %c0_25, %c0_26] : memref<1x1x128xf32, #tpu.memory_space<vmem>>, vector<1x1x128xf32>
    %36 = vector.shape_cast %35 : vector<1x1x128xf32> to vector<1x128xf32>
    %37 = vector.broadcast %36 : vector<1x128xf32> to vector<128x128xf32>
    %38 = arith.addf %34, %37 : vector<128x128xf32>
    %39 = arith.mulf %10, %38 : vector<128x128xf32>
    %40 = arith.truncf %39 : vector<128x128xf32> to vector<128x128xbf16>
    %c0_27 = arith.constant 0 : index
    %c0_28 = arith.constant 0 : index
    %41 = vector.load %arg23[%c0_27, %c0_28] : memref<16x128xf32, #tpu.memory_space<vmem>>, vector<16x128xf32>
    %c0_29 = arith.constant 0 : index
    %c0_30 = arith.constant 0 : index
    %42 = vector.load %arg5[%c0_29, %c0_30] : memref<16x128xbf16, #tpu.memory_space<vmem>>, vector<16x128xbf16>
    %cst_31 = arith.constant dense<0.000000e+00> : vector<16x128xf32>
    %43 = tpu.matmul %42, %40, %cst_31 {dimension_numbers = #tpu.dot_dimension_numbers<[1], [0], [0], [1], [0, 0, 1, 1], [], []>} : vector<16x128xbf16>, vector<128x128xbf16>, vector<16x128xf32> -> vector<16x128xf32>
    %44 = arith.addf %41, %43 : vector<16x128xf32>
    %c0_32 = arith.constant 0 : index
    %c0_33 = arith.constant 0 : index
    %45 = vector.load %arg23[%c0_32, %c0_33] : memref<16x128xf32, #tpu.memory_space<vmem>>, vector<16x128xf32>
    tpu.vector_store %arg23[%c0_32, %c0_33], %44 {strides = array<i32>} : memref<16x128xf32, #tpu.memory_space<vmem>>, vector<16x128xf32>,
    %c0_i32_34 = arith.constant 0 : i32
    %46 = arith.cmpi eq, %arg1, %c0_i32_34 : i32
    %47 = arith.extui %46 : i1 to i32
    %c0_i32_35 = arith.constant 0 : i32
    %48 = arith.cmpi ne, %47, %c0_i32_35 : i32
    scf.if %48 {
      %c0_38 = arith.constant 0 : index
      %c0_39 = arith.constant 0 : index
      %54 = vector.load %arg23[%c0_38, %c0_39] : memref<16x128xf32, #tpu.memory_space<vmem>>, vector<16x128xf32>
      %55 = arith.truncf %54 : vector<16x128xf32> to vector<16x128xbf16>
      %c0_40 = arith.constant 0 : index
      %c0_41 = arith.constant 0 : index
      %c0_42 = arith.constant 0 : index
      %56 = vector.load %arg12[%c0_40, %c0_41, %c0_42] : memref<1x128x128xbf16, #tpu.memory_space<vmem>>, vector<1x128x128xbf16>
      %57 = vector.shape_cast %56 : vector<1x128x128xbf16> to vector<128x128xbf16>
      %cst_43 = arith.constant dense<0.000000e+00> : vector<16x128xf32>
      %58 = tpu.matmul %55, %57, %cst_43 {dimension_numbers = #tpu.dot_dimension_numbers<[1], [0], [0], [1], [0, 0, 1, 1], [], []>} : vector<16x128xbf16>, vector<128x128xbf16>, vector<16x128xf32> -> vector<16x128xf32>
      %c0_44 = arith.constant 0 : index
      %c0_45 = arith.constant 0 : index
      %c0_46 = arith.constant 0 : index
      %59 = vector.load %arg13[%c0_44, %c0_45, %c0_46] : memref<1x1x128xf32, #tpu.memory_space<vmem>>, vector<1x1x128xf32>
      %60 = vector.shape_cast %59 : vector<1x1x128xf32> to vector<1x128xf32>
      %61 = vector.broadcast %60 : vector<1x128xf32> to vector<16x128xf32>
      %62 = arith.addf %58, %61 : vector<16x128xf32>
      %cst_47 = arith.constant 0.000000e+00 : f32
      %63 = vector.broadcast %cst_47 : f32 to vector<16x128xf32>
      %64 = arith.maximumf %62, %63 : vector<16x128xf32>
      %65 = math.absf %62 : vector<16x128xf32>
      %cst_48 = arith.constant 0.000000e+00 : f32
      %66 = vector.broadcast %cst_48 : f32 to vector<16x128xf32>
      %67 = arith.subf %66, %65 : vector<16x128xf32>
      %68 = math.exp %67 : vector<16x128xf32>
      %cst_49 = arith.constant 1.000000e+00 : f32
      %69 = vector.broadcast %cst_49 : f32 to vector<16x128xf32>
      %70 = arith.addf %69, %68 : vector<16x128xf32>
      %71 = math.log %70 : vector<16x128xf32>
      %72 = arith.addf %64, %71 : vector<16x128xf32>
      %cst_50 = arith.constant 0.693147182 : f32
      %73 = vector.broadcast %cst_50 : f32 to vector<16x128xf32>
      %74 = arith.subf %72, %73 : vector<16x128xf32>
      %75 = arith.truncf %74 : vector<16x128xf32> to vector<16x128xbf16>
      %c0_51 = arith.constant 0 : index
      %c0_52 = arith.constant 0 : index
      %c0_53 = arith.constant 0 : index
      %76 = vector.load %arg14[%c0_51, %c0_52, %c0_53] : memref<1x128x128xbf16, #tpu.memory_space<vmem>>, vector<1x128x128xbf16>
      %77 = vector.shape_cast %76 : vector<1x128x128xbf16> to vector<128x128xbf16>
      %cst_54 = arith.constant dense<0.000000e+00> : vector<16x128xf32>
      %78 = tpu.matmul %75, %77, %cst_54 {dimension_numbers = #tpu.dot_dimension_numbers<[1], [0], [0], [1], [0, 0, 1, 1], [], []>} : vector<16x128xbf16>, vector<128x128xbf16>, vector<16x128xf32> -> vector<16x128xf32>
      %c0_55 = arith.constant 0 : index
      %c0_56 = arith.constant 0 : index
      %c0_57 = arith.constant 0 : index
      %79 = vector.load %arg15[%c0_55, %c0_56, %c0_57] : memref<1x1x128xf32, #tpu.memory_space<vmem>>, vector<1x1x128xf32>
      %80 = vector.shape_cast %79 : vector<1x1x128xf32> to vector<1x128xf32>
      %81 = vector.broadcast %80 : vector<1x128xf32> to vector<16x128xf32>
      %82 = arith.addf %78, %81 : vector<16x128xf32>
      %c0_58 = arith.constant 0 : index
      %c0_59 = arith.constant 0 : index
      %83 = vector.load %arg21[%c0_58, %c0_59] : memref<16x128xf32, #tpu.memory_space<vmem>>, vector<16x128xf32>
      %84 = arith.addf %83, %82 : vector<16x128xf32>
      %c0_60 = arith.constant 0 : index
      %c0_61 = arith.constant 0 : index
      %85 = vector.load %arg21[%c0_60, %c0_61] : memref<16x128xf32, #tpu.memory_space<vmem>>, vector<16x128xf32>
      tpu.vector_store %arg21[%c0_60, %c0_61], %84 {strides = array<i32>} : memref<16x128xf32, #tpu.memory_space<vmem>>, vector<16x128xf32>,
    } else {
    }
    %c1_i32 = arith.constant 1 : i32
    %49 = arith.cmpi eq, %arg0, %c1_i32 : i32
    %c0_i32_36 = arith.constant 0 : i32
    %50 = arith.cmpi eq, %arg1, %c0_i32_36 : i32
    %51 = arith.andi %49, %50 : i1
    %52 = arith.extui %51 : i1 to i32
    %c0_i32_37 = arith.constant 0 : i32
    %53 = arith.cmpi ne, %52, %c0_i32_37 : i32
    scf.if %53 {
      %c0_38 = arith.constant 0 : index
      %c0_39 = arith.constant 0 : index
      %54 = vector.load %arg21[%c0_38, %c0_39] : memref<16x128xf32, #tpu.memory_space<vmem>>, vector<16x128xf32>
      %55 = arith.truncf %54 : vector<16x128xf32> to vector<16x128xbf16>
      %c0_40 = arith.constant 0 : index
      %c0_41 = arith.constant 0 : index
      %56 = vector.load %arg16[%c0_40, %c0_41] : memref<128x128xbf16, #tpu.memory_space<vmem>>, vector<128x128xbf16>
      %cst_42 = arith.constant dense<0.000000e+00> : vector<16x128xf32>
      %57 = tpu.matmul %55, %56, %cst_42 {dimension_numbers = #tpu.dot_dimension_numbers<[1], [0], [0], [1], [0, 0, 1, 1], [], []>} : vector<16x128xbf16>, vector<128x128xbf16>, vector<16x128xf32> -> vector<16x128xf32>
      %c0_43 = arith.constant 0 : index
      %c0_44 = arith.constant 0 : index
      %58 = vector.load %arg17[%c0_43, %c0_44] : memref<1x128xf32, #tpu.memory_space<vmem>>, vector<1x128xf32>
      %59 = vector.broadcast %58 : vector<1x128xf32> to vector<16x128xf32>
      %60 = arith.addf %57, %59 : vector<16x128xf32>
      %cst_45 = arith.constant 0.000000e+00 : f32
      %61 = vector.broadcast %cst_45 : f32 to vector<16x128xf32>
      %62 = arith.maximumf %60, %61 : vector<16x128xf32>
      %63 = math.absf %60 : vector<16x128xf32>
      %cst_46 = arith.constant 0.000000e+00 : f32
      %64 = vector.broadcast %cst_46 : f32 to vector<16x128xf32>
      %65 = arith.subf %64, %63 : vector<16x128xf32>
      %66 = math.exp %65 : vector<16x128xf32>
      %cst_47 = arith.constant 1.000000e+00 : f32
      %67 = vector.broadcast %cst_47 : f32 to vector<16x128xf32>
      %68 = arith.addf %67, %66 : vector<16x128xf32>
      %69 = math.log %68 : vector<16x128xf32>
      %70 = arith.addf %62, %69 : vector<16x128xf32>
      %cst_48 = arith.constant 0.693147182 : f32
      %71 = vector.broadcast %cst_48 : f32 to vector<16x128xf32>
      %72 = arith.subf %70, %71 : vector<16x128xf32>
      %73 = arith.truncf %72 : vector<16x128xf32> to vector<16x128xbf16>
      %c0_49 = arith.constant 0 : index
      %c0_50 = arith.constant 0 : index
      %74 = vector.load %arg18[%c0_49, %c0_50] : memref<128x128xbf16, #tpu.memory_space<vmem>>, vector<128x128xbf16>
      %cst_51 = arith.constant dense<0.000000e+00> : vector<16x128xf32>
      %75 = tpu.matmul %73, %74, %cst_51 {dimension_numbers = #tpu.dot_dimension_numbers<[1], [0], [0], [1], [0, 0, 1, 1], [], []>} : vector<16x128xbf16>, vector<128x128xbf16>, vector<16x128xf32> -> vector<16x128xf32>
      %c0_52 = arith.constant 0 : index
      %c0_53 = arith.constant 0 : index
      %76 = vector.load %arg19[%c0_52, %c0_53] : memref<1x128xf32, #tpu.memory_space<vmem>>, vector<1x128xf32>
      %77 = vector.broadcast %76 : vector<1x128xf32> to vector<16x128xf32>
      %78 = arith.addf %75, %77 : vector<16x128xf32>
      %c0_54 = arith.constant 0 : index
      %c0_55 = arith.constant 0 : index
      %79 = vector.load %arg20[%c0_54, %c0_55] : memref<16x128xf32, #tpu.memory_space<vmem>>, vector<16x128xf32>
      tpu.vector_store %arg20[%c0_54, %c0_55], %78 {strides = array<i32>} : memref<16x128xf32, #tpu.memory_space<vmem>>, vector<16x128xf32>,
    } else {
    }
    return
  }
  func.func @transform_0(%arg0: i32, %arg1: i32) -> (i32, i32) {
    %c0_i32 = arith.constant 0 : i32
    %c0_i32_0 = arith.constant 0 : i32
    %c0_i32_1 = arith.constant 0 : i32
    return %c0_i32, %c0_i32_0 : i32, i32
  }
  func.func @transform_1(%arg0: i32, %arg1: i32) -> (i32, i32) {
    %c0_i32 = arith.constant 0 : i32
    %c0_i32_0 = arith.constant 0 : i32
    return %arg1, %c0_i32 : i32, i32
  }
  func.func @transform_2(%arg0: i32, %arg1: i32) -> (i32, i32) {
    %c0_i32 = arith.constant 0 : i32
    %c0_i32_0 = arith.constant 0 : i32
    return %arg1, %c0_i32 : i32, i32
  }
  func.func @transform_3(%arg0: i32, %arg1: i32) -> (i32, i32) {
    %c0_i32 = arith.constant 0 : i32
    %c0_i32_0 = arith.constant 0 : i32
    return %c0_i32, %arg1 : i32, i32
  }
  func.func @transform_4(%arg0: i32, %arg1: i32) -> (i32, i32, i32) {
    %c0_i32 = arith.constant 0 : i32
    %c0_i32_0 = arith.constant 0 : i32
    %c0_i32_1 = arith.constant 0 : i32
    return %arg0, %c0_i32, %c0_i32_0 : i32, i32, i32
  }
  func.func @transform_5(%arg0: i32, %arg1: i32) -> (i32, i32, i32) {
    %c0_i32 = arith.constant 0 : i32
    %c0_i32_0 = arith.constant 0 : i32
    %c0_i32_1 = arith.constant 0 : i32
    return %arg0, %c0_i32, %c0_i32_0 : i32, i32, i32
  }
  func.func @transform_6(%arg0: i32, %arg1: i32) -> (i32, i32, i32) {
    %c0_i32 = arith.constant 0 : i32
    %c0_i32_0 = arith.constant 0 : i32
    %c0_i32_1 = arith.constant 0 : i32
    return %arg0, %c0_i32, %c0_i32_0 : i32, i32, i32
  }
  func.func @transform_7(%arg0: i32, %arg1: i32) -> (i32, i32, i32) {
    %c0_i32 = arith.constant 0 : i32
    %c0_i32_0 = arith.constant 0 : i32
    %c0_i32_1 = arith.constant 0 : i32
    return %arg0, %c0_i32, %c0_i32_0 : i32, i32, i32
  }
  func.func @transform_8(%arg0: i32, %arg1: i32) -> (i32, i32, i32) {
    %c0_i32 = arith.constant 0 : i32
    %c0_i32_0 = arith.constant 0 : i32
    %c0_i32_1 = arith.constant 0 : i32
    return %arg0, %c0_i32, %c0_i32_0 : i32, i32, i32
  }
  func.func @transform_9(%arg0: i32, %arg1: i32) -> (i32, i32, i32) {
    %c0_i32 = arith.constant 0 : i32
    %c0_i32_0 = arith.constant 0 : i32
    %c0_i32_1 = arith.constant 0 : i32
    return %arg0, %c0_i32, %c0_i32_0 : i32, i32, i32
  }
  func.func @transform_10(%arg0: i32, %arg1: i32) -> (i32, i32, i32) {
    %c0_i32 = arith.constant 0 : i32
    %c0_i32_0 = arith.constant 0 : i32
    %c0_i32_1 = arith.constant 0 : i32
    return %arg0, %c0_i32, %c0_i32_0 : i32, i32, i32
  }
  func.func @transform_11(%arg0: i32, %arg1: i32) -> (i32, i32, i32) {
    %c0_i32 = arith.constant 0 : i32
    %c0_i32_0 = arith.constant 0 : i32
    %c0_i32_1 = arith.constant 0 : i32
    return %arg0, %c0_i32, %c0_i32_0 : i32, i32, i32
  }
  func.func @transform_12(%arg0: i32, %arg1: i32) -> (i32, i32, i32) {
    %c0_i32 = arith.constant 0 : i32
    %c0_i32_0 = arith.constant 0 : i32
    %c0_i32_1 = arith.constant 0 : i32
    return %arg0, %c0_i32, %c0_i32_0 : i32, i32, i32
  }
  func.func @transform_13(%arg0: i32, %arg1: i32) -> (i32, i32, i32) {
    %c0_i32 = arith.constant 0 : i32
    %c0_i32_0 = arith.constant 0 : i32
    %c0_i32_1 = arith.constant 0 : i32
    return %arg0, %c0_i32, %c0_i32_0 : i32, i32, i32
  }
  func.func @transform_14(%arg0: i32, %arg1: i32) -> (i32, i32) {
    %c0_i32 = arith.constant 0 : i32
    %c0_i32_0 = arith.constant 0 : i32
    %c0_i32_1 = arith.constant 0 : i32
    return %c0_i32, %c0_i32_0 : i32, i32
  }
  func.func @transform_15(%arg0: i32, %arg1: i32) -> (i32, i32) {
    %c0_i32 = arith.constant 0 : i32
    %c0_i32_0 = arith.constant 0 : i32
    %c0_i32_1 = arith.constant 0 : i32
    return %c0_i32, %c0_i32_0 : i32, i32
  }
  func.func @transform_16(%arg0: i32, %arg1: i32) -> (i32, i32) {
    %c0_i32 = arith.constant 0 : i32
    %c0_i32_0 = arith.constant 0 : i32
    %c0_i32_1 = arith.constant 0 : i32
    return %c0_i32, %c0_i32_0 : i32, i32
  }
  func.func @transform_17(%arg0: i32, %arg1: i32) -> (i32, i32) {
    %c0_i32 = arith.constant 0 : i32
    %c0_i32_0 = arith.constant 0 : i32
    %c0_i32_1 = arith.constant 0 : i32
    return %c0_i32, %c0_i32_0 : i32, i32
  }
  func.func @transform_18(%arg0: i32, %arg1: i32) -> (i32, i32) {
    %c0_i32 = arith.constant 0 : i32
    %c0_i32_0 = arith.constant 0 : i32
    %c0_i32_1 = arith.constant 0 : i32
    return %c0_i32, %c0_i32_0 : i32, i32
  }
}

</mosaic_0001>

<bundles_post_ra>
// kernel: custom-call.8
= control target key start
LH: loop header
LB: loop body
LE: loop exit
PB: predicated region body
PF: predicated region fallthrough
CT: control target
= control target key end

     0   :  { %s6_s0 = inlined_call_operand.vmem [shape: bf16[2,64], index: 0, kind: output, shape index: {}]  }

// kernel: schnet_nuc_forward.1
= control target key start
LH: loop header
LB: loop body
LE: loop exit
PB: predicated region body
PF: predicated region fallthrough
CT: control target
= control target key end

     0   :  { %s3167_s27 = smov 0   ;;  %s3169_s28 = smov 0   ;;  %s3610_s0 = inlined_call_operand.vmem [shape: f32[16,128], index: 0, kind: input, shape index: {}]   ;;  %s3611_s1 = inlined_call_operand.vmem [shape: bf16[128,128], index: 1, kind: input, shape index: {}]   ;;  %s3612_s2 = inlined_call_operand.vmem [shape: bf16[128,16], index: 2, kind: input, shape index: {}]   ;;  %s3613_s3 = inlined_call_operand.vmem [shape: bf16[16,128], index: 3, kind: input, shape index: {}]   ;;  %s3614_s4 = inlined_call_operand.vmem [shape: bf16[2,128,128], index: 4, kind: input, shape index: {}]   ;;  %s3615_s5 = inlined_call_operand.vmem [shape: f32[2,1,128], index: 5, kind: input, shape index: {}]   ;;  %s3616_s6 = inlined_call_operand.vmem [shape: bf16[2,128,128], index: 6, kind: input, shape index: {}]   ;;  %s3617_s7 = inlined_call_operand.vmem [shape: f32[2,1,128], index: 7, kind: input, shape index: {}]   ;;  %s3618_s8 = inlined_call_operand.vmem [shape: bf16[2,128,128], index: 8, kind: input, shape index: {}]   ;;  %s3619_s9 = inlined_call_operand.vmem [shape: f32[2,1,128], index: 9, kind: input, shape index: {}]   ;;  %s3620_s10 = inlined_call_operand.vmem [shape: bf16[2,128,128], index: 10, kind: input, shape index: {}]   ;;  %s3621_s11 = inlined_call_operand.vmem [shape: f32[2,1,128], index: 11, kind: input, shape index: {}]   ;;  %s3622_s12 = inlined_call_operand.vmem [shape: bf16[2,128,128], index: 12, kind: input, shape index: {}]   ;;  %s3623_s13 = inlined_call_operand.vmem [shape: f32[2,1,128], index: 13, kind: input, shape index: {}]   ;;  %s3624_s14 = inlined_call_operand.vmem [shape: bf16[128,128], index: 14, kind: input, shape index: {}]   ;;  %s3625_s15 = inlined_call_operand.vmem [shape: f32[1,128], index: 15, kind: input, shape index: {}]   ;;  %s3626_s16 = inlined_call_operand.vmem [shape: bf16[128,128], index: 16, kind: input, shape index: {}]   ;;  %s3627_s17 = inlined_call_operand.vmem [shape: f32[1,128], index: 17, kind: input, shape index: {}]   ;;  %s3628_s18 = inlined_call_operand.vmem [shape: f32[16,128], index: 18, kind: output, shape index: {}]  }
   0x1   :  { %3635 = sst [smem:[#allocation8_spill]] %s3610_s0  ;;  %s3171_s29 = smov 0  }
   0x2   :  { %3636 = sst [smem:[#allocation9_spill]] %s3611_s1 }
   0x3   :  { %3637 = sst [smem:[#allocation10_spill]] %s3612_s2 }
   0x4   :  { %3638 = sst [smem:[#allocation11_spill]] %s3614_s4 }
   0x5   :  { %3639 = sst [smem:[#allocation12_spill]] %s3616_s6 }
   0x6   :  { %3640 = sst [smem:[#allocation13_spill]] %s3618_s8 }
   0x7   :  { %3641 = sst [smem:[#allocation14_spill]] %s3625_s15 }
   0x8   :  { %3642 = sst [smem:[#allocation15_spill]] %s3627_s17 }
   0x9   :  { %3643 = sst [smem:[#allocation16_spill]] %s3628_s18 }
   0xa LB: > { %3644 = sst [smem:[#allocation5_spill]] %s3062_s28  ;;  %s40_s30 = sadd.s32 1, %s3062_s28  ;;  %s3066_s29 = sphi %s3171_s29, %s28_s29   ;;  %s3062_s28 = sphi %s3169_s28, %s3662_s28   ;;  %s3058_s27 = sphi %s3167_s27, %s3661_s27  }
   0xb   : > { %3645 = sst [smem:[#allocation6_spill]] %s3066_s29  ;;  %p2436_p0 = scmp.ge.s32.totalorder %s3066_s29, 1 }
   0xc   : > { %p42_p1 = scmp.ge.s32.totalorder %s40_s30, 2  ;;  %p630_p2 = scmp.lt.s32.totalorder %s3066_s29, 3 }
   0xe   : > { %s3664_s30 = smov (%p42_p1, %s40_s30), 0  ;;  %p631_p3 = pnand %p2436_p0, %p630_p2 }
   0xf   : > { %3646 = sst [smem:[#allocation7_spill]] %s3664_s30  ;;  %p744_p4 = scmp.lt.s32.totalorder (!%p631_p3), %s3058_s27, 1 }
  0x10   : > { %634 = sbr.rel (%p631_p3) target bundleno = 2002 (0x7d2), region = 92  ;;  %p785_p5 = scmp.eq.s32.totalorder (!%p631_p3), %s3058_s27, 0 }
  0x11   : > { %s3647_s4 = sld [smem:[#allocation11_spill]] (!%p631_p3)  ;;  %s3648_s6 = sld [smem:[#allocation12_spill]] (!%p631_p3) }
  0x12   : > { %s3649_s8 = sld [smem:[#allocation13_spill]] (!%p631_p3) }
  0x17   : > { %s3190_s0 = scalar_select %p744_p4, %s3058_s27, 1 }
  0x18   : > { %790 = sbr.rel (!%p785_p5) target bundleno = 32 (0x20), region = 96  ;;  %s3650_s22 = sld [smem:[#allocation8_spill]] (%p785_p5) }
  0x19   : > { %s2559_s19 = sshll.u32 %s3190_s0, 6 }
  0x1a   : > { %s3200_s23 = scalar_lea.vmem %s3647_s4, %s2559_s19  ;;  %s3205_s26 = scalar_lea.vmem %s3648_s6, %s2559_s19 }
  0x1b   : > { %s3214_s15 = scalar_lea.vmem %s3649_s8, %s2559_s19  ;;  %s3223_s4 = scalar_lea.vmem %s3620_s10, %s2559_s19 }
  0x1c   : > { %s775_s6 = scalar_lea.vmem %s3621_s11, %s3190_s0  ;;  %s3232_s29 = scalar_lea.vmem %s3622_s12, %s2559_s19 }
  0x1d   : > { %s783_s8 = scalar_lea.vmem %s3623_s13, %s3190_s0 }
  0x1e   : > { %v791_v0 = vld [vmem:[%s3650_s22] sm:$0xff] (%p785_p5)  ;;  %v792_v1 = vld [vmem:[%s3650_s22 + $0x8] sm:$0xff] (%p785_p5) }
  0x1f   : > { %793 = vst [vmem:[#allocation2] sm:$0xff] %v791_v0  ;;  %794 = vst [vmem:[#allocation2 + $0x8] sm:$0xff] %v792_v1 }
  0x20 PF: > { %v2891_v2 = vld [vmem:[%s3200_s23] sm:$0xff]   ;;  %v3068_v3 = vmov 0.0   ;;  %v2892_v4 = vld [vmem:[%s3200_s23 + $0x8] sm:$0xff]   ;;  %vm3069_vm0 = vmmov 0   ;;  %v2893_v5 = vld [vmem:[%s3200_s23 + $0x10] sm:$0xff]   ;;  %s3651_s25 = sld [smem:[#allocation10_spill]]  ;;  %s3655_s18 = scalar_lea.vmem %s3619_s9, %s3190_s0 }
  0x21   : > { %2661 = vmatprep.subr.bf16.mxu0 %v3068_v3  ;;  %2677 = vmatprep.mubr.msk.bf16.mxu0 %vm3069_vm0, %v3068_v3  ;;  %v2894_v6 = vld [vmem:[%s3200_s23 + $0x18] sm:$0xff]   ;;  %v2895_v7 = vld [vmem:[%s3200_s23 + $0x20] sm:$0xff]   ;;  %v2896_v8 = vld [vmem:[%s3200_s23 + $0x28] sm:$0xff]   ;;  %vm974_vm1 = vcmask 130048   ;;  %s3653_s2 = sld [smem:[#allocation9_spill]]  ;;  %p2000_p6 = scmp.eq.s32.totalorder %s3058_s27, 1 }
  0x22   : > { %2662 = vmatpush3.bf16.msra.mxu0 %v2891_v2  ;;  %v2897_v9 = vld [vmem:[%s3200_s23 + $0x30] sm:$0xff]   ;;  %v2898_v10 = vld [vmem:[%s3200_s23 + $0x38] sm:$0xff]   ;;  %s3652_s23 = scalar_lea.vmem %s3615_s5, %s3190_s0  ;;  %v2901_v23 = vld [vmem:[%s3205_s26] sm:$0xff]   ;;  %vm3071_vm2 = vmmov (%p2000_p6), 0   ;;  %s3657_s24 = sld [smem:[#allocation15_spill]] (%p2000_p6) }
  0x23   : > { %2663 = vmatprep.subr.bf16.mxu0 %v3068_v3  ;;  %v2448_v15 = vld [vmem:[%s3652_s23] ss:$0 sm:$0xff]  ;;  %v2902_v26 = vld [vmem:[%s3205_s26 + $0x8] sm:$0xff]   ;;  %v2905_v27 = vld [vmem:[%s3205_s26 + $0x10] sm:$0xff]   ;;  %s3658_s28 = sld [smem:[#allocation16_spill]] (%p2000_p6) }
  0x24   : > { %v2906_v30 = vld [vmem:[%s3205_s26 + $0x18] sm:$0xff]   ;;  %v2909_v31 = vld [vmem:[%s3205_s26 + $0x20] sm:$0xff]   ;;  %v2910_v34 = vld [vmem:[%s3205_s26 + $0x28] sm:$0xff]  }
  0x25   : > { %v2913_v35 = vld [vmem:[%s3205_s26 + $0x30] sm:$0xff]   ;;  %v2914_v38 = vld [vmem:[%s3205_s26 + $0x38] sm:$0xff]   ;;  %v2923_v46 = vld [vmem:[%s3214_s15] sm:$0xff]   ;;  %s3654_s26 = scalar_lea.vmem %s3617_s7, %s3190_s0 }
  0x26   : > { %2664 = vmatpush3.bf16.msra.mxu0 %v2892_v4  ;;  %v798_v11 = vld [vmem:[#allocation2] sm:$0xff]  ;;  %v799_v12 = vld [vmem:[#allocation2 + $0x8] sm:$0xff]  ;;  %v2903_v25 = vld [vmem:[%s3651_s25 + $0x10] sm:$0xff]  }
  0x27   : > { %2665 = vmatprep.subr.bf16.mxu0 %v3068_v3  ;;  %v800_v13 = vpack.c.bf16 %v799_v12, %v798_v11  ;;  %v2899_v14 = vld [vmem:[%s3651_s25] sm:$0xff]   ;;  %v2900_v24 = vld [vmem:[%s3651_s25 + $0x8] sm:$0xff]   ;;  %v2904_v28 = vld [vmem:[%s3651_s25 + $0x18] sm:$0xff]  }
  0x28   : > { %2683 = vmatprep.mubr.msk.bf16.mxu1 %vm974_vm1, %v2899_v14  ;;  %v2907_v29 = vld [vmem:[%s3651_s25 + $0x20] sm:$0xff]   ;;  %v2908_v32 = vld [vmem:[%s3651_s25 + $0x28] sm:$0xff]   ;;  %v2911_v33 = vld [vmem:[%s3651_s25 + $0x30] sm:$0xff]  }
  0x29   : > { %v2912_v36 = vld [vmem:[%s3651_s25 + $0x38] sm:$0xff]   ;;  %v2915_v37 = vld [vmem:[%s3653_s2] sm:$0xff]   ;;  %v2916_v39 = vld [vmem:[%s3653_s2 + $0x8] sm:$0xff]  }
  0x2a   : > { %2666 = vmatpush3.bf16.msra.mxu0 %v2893_v5  ;;  %v2917_v40 = vld [vmem:[%s3653_s2 + $0x10] sm:$0xff]   ;;  %v2918_v41 = vld [vmem:[%s3653_s2 + $0x18] sm:$0xff]   ;;  %v2919_v42 = vld [vmem:[%s3653_s2 + $0x20] sm:$0xff]  }
  0x2b   : > { %2667 = vmatprep.subr.bf16.mxu0 %v3068_v3  ;;  %v2920_v43 = vld [vmem:[%s3653_s2 + $0x28] sm:$0xff]   ;;  %v2921_v44 = vld [vmem:[%s3653_s2 + $0x30] sm:$0xff]   ;;  %v2922_v45 = vld [vmem:[%s3653_s2 + $0x38] sm:$0xff]  }
  0x2c   : > { %v2924_v47 = vld [vmem:[%s3214_s15 + $0x8] sm:$0xff]   ;;  %v2925_v48 = vld [vmem:[%s3214_s15 + $0x10] sm:$0xff]   ;;  %v2926_v49 = vld [vmem:[%s3214_s15 + $0x18] sm:$0xff]  }
  0x2d   : > { %v2927_v50 = vld [vmem:[%s3214_s15 + $0x20] sm:$0xff]   ;;  %v2928_v51 = vld [vmem:[%s3214_s15 + $0x28] sm:$0xff]   ;;  %v2929_v52 = vld [vmem:[%s3214_s15 + $0x30] sm:$0xff]  }
  0x2e   : > { %2668 = vmatpush3.bf16.msra.mxu0 %v2894_v6  ;;  %v2930_v53 = vld [vmem:[%s3214_s15 + $0x38] sm:$0xff]   ;;  %s3659_s15 = smov (%p2000_p6), %s3658_s28 }
  0x2f   : > { %2669 = vmatprep.subr.bf16.mxu0 %v3068_v3 }
  0x32   : > { %2670 = vmatpush3.bf16.msra.mxu0 %v2895_v7  ;;  %v3380_v7 = vld [vmem:[%s3654_s26] ss:$0 sm:$0xff] }
  0x33   : > { %2671 = vmatprep.subr.bf16.mxu0 %v3068_v3 }
  0x36   : > { %2672 = vmatpush3.bf16.msra.mxu0 %v2896_v8 }
  0x37   : > { %2673 = vmatprep.subr.bf16.mxu0 %v3068_v3 }
  0x3a   : > { %2674 = vmatpush3.bf16.msra.mxu0 %v2897_v9 }
  0x3b   : > { %2675 = vmatprep.subr.bf16.mxu0 %v3068_v3 }
  0x3e   : > { %2676 = vmatpush3.bf16.msra.mxu0 %v2898_v10 }
  0x3f   : > { %2731 = vmatprep.subr.bf16.mxu0 %v2923_v46 }
  0x41   : > { %2678 = vmatmul.mubr.bf16.vlgmr.msra.gmra.mrb[0].mxu0 %v800_v13 }
  0x42   : > { %2732 = vmatpush3.bf16.msra.mxu0 %v2923_v46 }
  0x43   : > { %2733 = vmatprep.subr.bf16.mxu0 %v2924_v47 }
  0x46   : > { %2734 = vmatpush3.bf16.msra.mxu0 %v2924_v47 }
  0x47   : > { %2735 = vmatprep.subr.bf16.mxu0 %v2925_v48 }
  0x4a   : > { %2736 = vmatpush3.bf16.msra.mxu0 %v2925_v48 }
  0x4b   : > { %2737 = vmatprep.subr.bf16.mxu0 %v2926_v49 }
  0x4e   : > { %2738 = vmatpush3.bf16.msra.mxu0 %v2926_v49 }
  0x4f   : > { %2739 = vmatprep.subr.bf16.mxu0 %v2927_v50 }
  0x52   : > { %2740 = vmatpush3.bf16.msra.mxu0 %v2927_v50 }
  0x53   : > { %2741 = vmatprep.subr.bf16.mxu0 %v2928_v51 }
  0x56   : > { %2742 = vmatpush3.bf16.msra.mxu0 %v2928_v51 }
  0x57   : > { %2743 = vmatprep.subr.bf16.mxu0 %v2929_v52 }
  0x5a   : > { %2744 = vmatpush3.bf16.msra.mxu0 %v2929_v52 }
  0x5b   : > { %2745 = vmatprep.subr.bf16.mxu0 %v2930_v53 }
  0x5e   : > { %2746 = vmatpush3.bf16.msra.mxu0 %v2930_v53 }
  0x5f   : > { %2783 = vmatprep.subr.bf16.mxu0 %v3068_v3 }
 0x114   : > { %v906_v16 = vpop.f32.mrb[0].mxu0 }
 0x115   : > { %v2679_v17 = vpop.f32.mrb[1].mxu0  ;;  %v907_v19 = vadd.f32 %v2448_v15, %v906_v16 }
 0x116   : > { %v909_v18 = vpop.f32.mrb[2].mxu0 }
 0x117   : > { %v910_v20 = vadd.f32 %v2448_v15, %v909_v18  ;;  %v2680_v21 = vpop.f32.mrb[3].mxu0 }
 0x119   : > { %v913_v22 = vpack.c.bf16 %v910_v20, %v907_v19 }
 0x11b   : > { %2681 = vmatprep.subr.bf16.mxu1 %v913_v22 }
 0x11c   : > { %2682 = vmatpush3.bf16.msra.mxu1 %v913_v22 }
 0x11d   : > { %2699 = vmatprep.subr.bf16.mxu1 %v2901_v23 }
 0x11f   : > { %2684 = vmatmul.mubr.msk.bf16.vlgmr.msra.gmra.mrb[0].mxu1 %vm974_vm1, %v2900_v24 }
 0x120   : > { %2700 = vmatpush3.bf16.msra.mxu1 %v2901_v23  ;;  %2687 = vmatprep.mubr.msk.bf16.mxu1 %vm974_vm1, %v2903_v25 }
 0x121   : > { %2701 = vmatprep.subr.bf16.mxu1 %v2902_v26 }
 0x124   : > { %2702 = vmatpush3.bf16.msra.mxu1 %v2902_v26 }
 0x125   : > { %2703 = vmatprep.subr.bf16.mxu1 %v2905_v27 }
 0x127   : > { %2688 = vmatmul.mubr.msk.bf16.gmra.mrb[4].mxu1 %vm974_vm1, %v2904_v28 }
 0x128   : > { %2704 = vmatpush3.bf16.msra.mxu1 %v2905_v27  ;;  %2691 = vmatprep.mubr.msk.bf16.mxu1 %vm974_vm1, %v2907_v29 }
 0x129   : > { %2705 = vmatprep.subr.bf16.mxu1 %v2906_v30 }
 0x12c   : > { %2706 = vmatpush3.bf16.msra.mxu1 %v2906_v30 }
 0x12d   : > { %2707 = vmatprep.subr.bf16.mxu1 %v2909_v31 }
 0x12f   : > { %2692 = vmatmul.mubr.msk.bf16.gmra.mrb[8].mxu1 %vm974_vm1, %v2908_v32 }
 0x130   : > { %2708 = vmatpush3.bf16.msra.mxu1 %v2909_v31  ;;  %2695 = vmatprep.mubr.msk.bf16.mxu1 %vm974_vm1, %v2911_v33 }
 0x131   : > { %2709 = vmatprep.subr.bf16.mxu1 %v2910_v34 }
 0x134   : > { %2710 = vmatpush3.bf16.msra.mxu1 %v2910_v34 }
 0x135   : > { %2711 = vmatprep.subr.bf16.mxu1 %v2913_v35 }
 0x137   : > { %2696 = vmatmul.mubr.msk.bf16.gmra.mrb[12].mxu1 %vm974_vm1, %v2912_v36 }
 0x138   : > { %2712 = vmatpush3.bf16.msra.mxu1 %v2913_v35  ;;  %2715 = vmatprep.mubr.bf16.mxu1 %v2915_v37 }
 0x139   : > { %2713 = vmatprep.subr.bf16.mxu1 %v2914_v38 }
 0x13c   : > { %2714 = vmatpush3.bf16.msra.mxu1 %v2914_v38 }
 0x13d   : > { %2763 = vmatprep.subr.bf16.mxu1 %v3068_v3 }
 0x13f   : > { %2716 = vmatmul.mubr.bf16.vlgmr.msra.gmra.mrb[16].mxu1 %v2916_v39 }
 0x140   : > { %2719 = vmatprep.mubr.bf16.mxu1 %v2917_v40 }
 0x147   : > { %2720 = vmatmul.mubr.bf16.gmra.mrb[20].mxu1 %v2918_v41 }
 0x148   : > { %2723 = vmatprep.mubr.bf16.mxu1 %v2919_v42 }
 0x14f   : > { %2724 = vmatmul.mubr.bf16.gmra.mrb[24].mxu1 %v2920_v43 }
 0x150   : > { %2727 = vmatprep.mubr.bf16.mxu1 %v2921_v44 }
 0x157   : > { %2728 = vmatmul.mubr.bf16.gmra.mrb[28].mxu1 %v2922_v45 }
 0x158   : > { %2779 = vmatprep.mubr.msk.bf16.mxu1 %vm3069_vm0, %v3068_v3 }
 0x1f2   : > { %v3343_v54 = vpop.f32.mrb[0].mxu1 }
 0x1f3   : > { %v3345_v55 = vpop.f32.mrb[1].mxu1 }
 0x1f4   : > { %v3347_v56 = vpop.f32.mrb[2].mxu1 }
 0x1f5   : > { %v3349_v57 = vpop.f32.mrb[3].mxu1 }
 0x1fa   : > { %v3351_v58 = vpop.f32.mrb[4].mxu1 }
 0x1fb   : > { %v3353_v59 = vpop.f32.mrb[5].mxu1 }
 0x1fc   : > { %v3355_v60 = vpop.f32.mrb[6].mxu1 }
 0x1fd   : > { %v3357_v61 = vpop.f32.mrb[7].mxu1 }
 0x202   : > { %v3359_v62 = vpop.f32.mrb[8].mxu1 }
 0x203   : > { %v3361_v63 = vpop.f32.mrb[9].mxu1 }
 0x204   : > { %v3363_v0 = vpop.f32.mrb[10].mxu1 }
 0x205   : > { %v3365_v1 = vpop.f32.mrb[11].mxu1 }
 0x20a   : > { %v3367_v2 = vpop.f32.mrb[12].mxu1 }
 0x20b   : > { %v3369_v4 = vpop.f32.mrb[13].mxu1 }
 0x20c   : > { %v3371_v5 = vpop.f32.mrb[14].mxu1 }
 0x20d   : > { %v3373_v6 = vpop.f32.mrb[15].mxu1 }
 0x212   : > { %v2717_v8 = vpop.f32.mrb[16].mxu1 }
 0x213   : > { %v3383_v9 = vadd.f32 %v2717_v8, %v3380_v7  ;;  %v1265_v10 = vpop.f32.mrb[17].mxu1 }
 0x214   : > { %v3386_v11 = vadd.f32 %v3380_v7, %v1265_v10  ;;  %v2718_v12 = vpop.f32.mrb[18].mxu1 }
 0x215   : > { %v1346_v13 = vand.u32 2147483647, %v3383_v9  ;;  %v3390_v14 = vadd.f32 %v2718_v12, %v3380_v7  ;;  %v1268_v15 = vpop.f32.mrb[19].mxu1 }
 0x216   : > { %v1344_v16 = vand.u32 2147483647, %v3386_v11  ;;  %v3394_v17 = vadd.f32 %v3380_v7, %v1268_v15 }
 0x217   : > { %v1362_v18 = vsub.f32 0.0, %v1346_v13  ;;  %v1347_v19 = vand.u32 2147483647, %v3390_v14 }
 0x218   : > { %v1360_v20 = vsub.f32 0.0, %v1344_v16  ;;  %v1345_v21 = vand.u32 2147483647, %v3394_v17 }
 0x219   : > { %v1380_v22 = vmul.f32 1.442695, %v1362_v18  ;;  %v1363_v23 = vsub.f32 0.0, %v1347_v19 }
 0x21a   : > { %v1376_v24 = vmul.f32 1.442695, %v1360_v20  ;;  %v1361_v25 = vsub.f32 0.0, %v1345_v21  ;;  %v2721_v26 = vpop.f32.mrb[20].mxu1 }
 0x21b   : > { %2948 = vpow2.f32 %v1380_v22  ;;  %v1382_v27 = vmul.f32 1.442695, %v1363_v23  ;;  %v3399_v28 = vadd.f32 %v2721_v26, %v3380_v7  ;;  %v1281_v29 = vpop.f32.mrb[21].mxu1 }
 0x21c   : > { %2950 = vpow2.f32 %v1376_v24  ;;  %v1378_v30 = vmul.f32 1.442695, %v1361_v25  ;;  %v3402_v31 = vadd.f32 %v3380_v7, %v1281_v29  ;;  %v2722_v32 = vpop.f32.mrb[22].mxu1 }
 0x21d   : > { %2952 = vpow2.f32 %v1382_v27  ;;  %v1350_v33 = vand.u32 2147483647, %v3399_v28  ;;  %v3406_v34 = vadd.f32 %v2722_v32, %v3380_v7  ;;  %v1284_v35 = vpop.f32.mrb[23].mxu1 }
 0x21e   : > { %2954 = vpow2.f32 %v1378_v30  ;;  %v1348_v36 = vand.u32 2147483647, %v3402_v31  ;;  %v3410_v37 = vadd.f32 %v3380_v7, %v1284_v35 }
 0x21f   : > { %v1366_v38 = vsub.f32 0.0, %v1350_v33  ;;  %v1351_v39 = vand.u32 2147483647, %v3406_v34 }
 0x220   : > { %v1364_v40 = vsub.f32 0.0, %v1348_v36  ;;  %v1349_v41 = vand.u32 2147483647, %v3410_v37 }
 0x221   : > { %v1388_v42 = vmul.f32 1.442695, %v1366_v38  ;;  %v1367_v43 = vsub.f32 0.0, %v1351_v39 }
 0x222   : > { %v1384_v44 = vmul.f32 1.442695, %v1364_v40  ;;  %v1365_v45 = vsub.f32 0.0, %v1349_v41  ;;  %v2725_v46 = vpop.f32.mrb[24].mxu1 }
 0x223   : > { %2956 = vpow2.f32 %v1388_v42  ;;  %v1390_v47 = vmul.f32 1.442695, %v1367_v43  ;;  %v3415_v48 = vadd.f32 %v2725_v46, %v3380_v7  ;;  %v1297_v49 = vpop.f32.mrb[25].mxu1 }
 0x224   : > { %2958 = vpow2.f32 %v1384_v44  ;;  %v1386_v50 = vmul.f32 1.442695, %v1365_v45  ;;  %v3418_v51 = vadd.f32 %v3380_v7, %v1297_v49  ;;  %v2726_v52 = vpop.f32.mrb[26].mxu1 }
 0x225   : > { %v2949_v53 = vpop.eup %2948  ;;  %2960 = vpow2.f32 %v1390_v47  ;;  %v1354_v8 = vand.u32 2147483647, %v3415_v48  ;;  %v3422_v10 = vadd.f32 %v2726_v52, %v3380_v7  ;;  %v1300_v12 = vpop.f32.mrb[27].mxu1  ;;  %v1330_v47 = vmax.f32 %v3383_v9, 0.0 }
 0x226   : > { %v2951_v13 = vpop.eup %2950  ;;  %v1410_v15 = vadd.f32 1.0, %v2949_v53  ;;  %2962 = vpow2.f32 %v1386_v50  ;;  %v1352_v16 = vand.u32 2147483647, %v3418_v51  ;;  %v3427_v25 = vadd.f32 %v3380_v7, %v1300_v12 }
 0x227   : > { %v2953_v18 = vpop.eup %2952  ;;  %v1408_v19 = vadd.f32 1.0, %v2951_v13  ;;  %v1370_v20 = vsub.f32 0.0, %v1354_v8  ;;  %v1355_v21 = vand.u32 2147483647, %v3422_v10 }
 0x228   : > { %v2955_v22 = vpop.eup %2954  ;;  %2964 = vlog2.f32 %v1410_v15  ;;  %v1411_v23 = vadd.f32 1.0, %v2953_v18  ;;  %v1368_v24 = vsub.f32 0.0, %v1352_v16  ;;  %v1353_v32 = vand.u32 2147483647, %v3427_v25 }
 0x229   : > { %2966 = vlog2.f32 %v1408_v19  ;;  %v1409_v26 = vadd.f32 1.0, %v2955_v22  ;;  %v1396_v27 = vmul.f32 1.442695, %v1370_v20  ;;  %v1371_v29 = vsub.f32 0.0, %v1355_v21 }
 0x22a   : > { %2968 = vlog2.f32 %v1411_v23  ;;  %v1392_v30 = vmul.f32 1.442695, %v1368_v24  ;;  %v2729_v33 = vpop.f32.mrb[28].mxu1  ;;  %v1369_v39 = vsub.f32 0.0, %v1353_v32  ;;  %v1328_v22 = vmax.f32 %v3386_v11, 0.0 }
 0x22b   : > { %2970 = vlog2.f32 %v1409_v26  ;;  %v1398_v35 = vmul.f32 1.442695, %v1371_v29  ;;  %v3431_v36 = vadd.f32 %v2729_v33, %v3380_v7  ;;  %v1313_v38 = vpop.f32.mrb[29].mxu1  ;;  %v1331_v29 = vmax.f32 %v3390_v14, 0.0 }
 0x22c   : > { %2972 = vpow2.f32 %v1396_v27  ;;  %v3434_v40 = vadd.f32 %v3380_v7, %v1313_v38  ;;  %v2730_v41 = vpop.f32.mrb[30].mxu1  ;;  %v1394_v53 = vmul.f32 1.442695, %v1369_v39  ;;  %v1329_v11 = vmax.f32 %v3394_v17, 0.0 }
 0x22d   : > { %v2957_v42 = vpop.eup %2956  ;;  %2974 = vpow2.f32 %v1392_v30  ;;  %v1358_v43 = vand.u32 2147483647, %v3431_v36  ;;  %v3438_v44 = vadd.f32 %v2730_v41, %v3380_v7  ;;  %v1316_v45 = vpop.f32.mrb[31].mxu1 }
 0x22e   : > { %v2959_v46 = vpop.eup %2958  ;;  %v1414_v49 = vadd.f32 1.0, %v2957_v42  ;;  %2976 = vpow2.f32 %v1398_v35  ;;  %v1356_v12 = vand.u32 2147483647, %v3434_v40  ;;  %v3444_v18 = vadd.f32 %v3380_v7, %v1316_v45 }
 0x22f   : > { %v2961_v50 = vpop.eup %2960  ;;  %v1412_v52 = vadd.f32 1.0, %v2959_v46  ;;  %v1374_v8 = vsub.f32 0.0, %v1358_v43  ;;  %v1359_v16 = vand.u32 2147483647, %v3438_v44 }
 0x230   : > { %v2963_v13 = vpop.eup %2962  ;;  %2978 = vlog2.f32 %v1414_v49  ;;  %v1415_v15 = vadd.f32 1.0, %v2961_v50  ;;  %v1372_v9 = vsub.f32 0.0, %v1356_v12  ;;  %v1357_v24 = vand.u32 2147483647, %v3444_v18 }
 0x231   : > { %2980 = vlog2.f32 %v1412_v52  ;;  %v1413_v19 = vadd.f32 1.0, %v2963_v13  ;;  %v1404_v20 = vmul.f32 1.442695, %v1374_v8  ;;  %v1375_v23 = vsub.f32 0.0, %v1359_v16 }
 0x232   : > { %v2965_v21 = vpop.eup %2964  ;;  %2982 = vlog2.f32 %v1415_v15  ;;  %v1400_v30 = vmul.f32 1.442695, %v1372_v9  ;;  %v1373_v35 = vsub.f32 0.0, %v1357_v24  ;;  %v1334_v9 = vmax.f32 %v3399_v28, 0.0 }
 0x233   : > { %v2967_v26 = vpop.eup %2966  ;;  %v1429_v27 = vmul.f32 0.6931472, %v2965_v21  ;;  %2984 = vlog2.f32 %v1413_v19  ;;  %v1406_v33 = vmul.f32 1.442695, %v1375_v23  ;;  %v1332_v23 = vmax.f32 %v3402_v31, 0.0 }
 0x234   : > { %v2969_v32 = vpop.eup %2968  ;;  %v1425_v7 = vmul.f32 0.6931472, %v2967_v26  ;;  %2986 = vpow2.f32 %v1394_v53  ;;  %v1402_v46 = vmul.f32 1.442695, %v1373_v35  ;;  %v1333_v35 = vmax.f32 %v3410_v37, 0.0 }
 0x235   : > { %v2971_v38 = vpop.eup %2970  ;;  %v1458_v39 = vadd.f32 %v1429_v27, %v1330_v47  ;;  %v1431_v41 = vmul.f32 0.6931472, %v2969_v32  ;;  %2988 = vpow2.f32 %v1404_v20 }
 0x236   : > { %v2973_v42 = vpop.eup %2972  ;;  %v1456_v43 = vadd.f32 %v1425_v7, %v1328_v22  ;;  %v1427_v45 = vmul.f32 0.6931472, %v2971_v38  ;;  %2990 = vpow2.f32 %v1400_v30  ;;  %v1335_v30 = vmax.f32 %v3406_v34, 0.0 }
 0x237   : > { %v2975_v49 = vpop.eup %2974  ;;  %v1459_v14 = vadd.f32 %v1431_v41, %v1331_v29  ;;  %v1418_v50 = vadd.f32 1.0, %v2973_v42  ;;  %2992 = vpow2.f32 %v1406_v33  ;;  %v2492_v12 = vadd.f32 -0.6931472, %v1458_v39 }
 0x238   : > { %v2977_v52 = vpop.eup %2976  ;;  %v1457_v8 = vadd.f32 %v1427_v45, %v1329_v11  ;;  %v1416_v53 = vadd.f32 1.0, %v2975_v49  ;;  %2994 = vpow2.f32 %v1402_v46  ;;  %v2490_v17 = vadd.f32 -0.6931472, %v1456_v43 }
 0x239   : > { %v2493_v13 = vadd.f32 -0.6931472, %v1459_v14  ;;  %2996 = vlog2.f32 %v1418_v50  ;;  %v1419_v47 = vadd.f32 1.0, %v2977_v52 }
 0x23a   : > { %v2979_v15 = vpop.eup %2978  ;;  %v2491_v16 = vadd.f32 -0.6931472, %v1457_v8  ;;  %2998 = vlog2.f32 %v1416_v53 }
 0x23b   : > { %v2981_v19 = vpop.eup %2980  ;;  %v1489_v20 = vpack.c.bf16 %v2493_v13, %v2492_v12  ;;  %v1437_v21 = vmul.f32 0.6931472, %v2979_v15  ;;  %3000 = vlog2.f32 %v1419_v47  ;;  %v1338_v13 = vmax.f32 %v3415_v48, 0.0 }
 0x23c   : > { %v2983_v22 = vpop.eup %2982  ;;  %v1433_v24 = vmul.f32 0.6931472, %v2981_v19  ;;  %v1488_v26 = vpack.c.bf16 %v2491_v16, %v2490_v17  ;;  %v1339_v19 = vmax.f32 %v3422_v10, 0.0 }
 0x23d   : > { %v2985_v27 = vpop.eup %2984  ;;  %v1462_v29 = vadd.f32 %v1437_v21, %v1334_v9  ;;  %v1439_v32 = vmul.f32 0.6931472, %v2983_v22 }
 0x23e   : > { %v2987_v7 = vpop.eup %2986  ;;  %v1460_v33 = vadd.f32 %v1433_v24, %v1332_v23  ;;  %v1435_v38 = vmul.f32 0.6931472, %v2985_v27  ;;  %2747 = vmatprep.mubr.bf16.mxu0 %v1488_v26  ;;  %v1336_v23 = vmax.f32 %v3418_v51, 0.0  ;;  %v1343_v51 = vmax.f32 %v3438_v44, 0.0 }
 0x23f   : > { %v2989_v39 = vpop.eup %2988  ;;  %v1463_v28 = vadd.f32 %v1439_v32, %v1335_v30  ;;  %v1417_v41 = vadd.f32 1.0, %v2987_v7  ;;  %2748 = vmatmul.mubr.bf16.vlgmr.msra.gmra.mrb[4].mxu0 %v1489_v20  ;;  %v2496_v45 = vadd.f32 -0.6931472, %v1462_v29  ;;  %v1337_v29 = vmax.f32 %v3427_v25, 0.0 }
 0x240   : > { %v2991_v11 = vpop.eup %2990  ;;  %v1461_v42 = vadd.f32 %v1435_v38, %v1333_v35  ;;  %v1422_v31 = vadd.f32 1.0, %v2989_v39  ;;  %v2494_v14 = vadd.f32 -0.6931472, %v1460_v33  ;;  %v1342_v33 = vmax.f32 %v3431_v36, 0.0 }
 0x241   : > { %v2993_v43 = vpop.eup %2992  ;;  %v2497_v46 = vadd.f32 -0.6931472, %v1463_v28  ;;  %3002 = vlog2.f32 %v1417_v41  ;;  %v1420_v49 = vadd.f32 1.0, %v2991_v11  ;;  %v1340_v39 = vmax.f32 %v3434_v40, 0.0 }
 0x242   : > { %v2995_v34 = vpop.eup %2994  ;;  %v2495_v50 = vadd.f32 -0.6931472, %v1461_v42  ;;  %3004 = vlog2.f32 %v1422_v31  ;;  %v1423_v52 = vadd.f32 1.0, %v2993_v43  ;;  %v1341_v31 = vmax.f32 %v3444_v18, 0.0 }
 0x243   : > { %v2997_v37 = vpop.eup %2996  ;;  %3006 = vlog2.f32 %v1420_v49  ;;  %v1421_v8 = vadd.f32 1.0, %v2995_v34  ;;  %v1491_v53 = vpack.c.bf16 %v2497_v46, %v2496_v45 }
 0x244   : > { %v2999_v12 = vpop.eup %2998  ;;  %v1445_v47 = vmul.f32 0.6931472, %v2997_v37  ;;  %3008 = vlog2.f32 %v1423_v52  ;;  %v1490_v15 = vpack.c.bf16 %v2495_v50, %v2494_v14  ;;  %v2932_v37 = vld [vmem:[%s3223_s4] sm:$0xff]  }
 0x245   : > { %v3001_v17 = vpop.eup %3000  ;;  %3010 = vlog2.f32 %v1421_v8  ;;  %v1441_v9 = vmul.f32 0.6931472, %v2999_v12  ;;  %2784 = vmatpush3.bf16.msra.mxu0 %v2932_v37  ;;  %v2933_v8 = vld [vmem:[%s3223_s4 + $0x8] sm:$0xff]   ;;  %v2935_v12 = vld [vmem:[%s3223_s4 + $0x18] sm:$0xff]  }
 0x246   : > { %v1466_v16 = vadd.f32 %v1445_v47, %v1338_v13  ;;  %v1447_v20 = vmul.f32 0.6931472, %v3001_v17  ;;  %2751 = vmatprep.mubr.bf16.mxu0 %v1490_v15  ;;  %2785 = vmatprep.subr.bf16.mxu0 %v3068_v3  ;;  %v2936_v13 = vld [vmem:[%s3223_s4 + $0x20] sm:$0xff]   ;;  %v2937_v47 = vld [vmem:[%s3223_s4 + $0x28] sm:$0xff]   ;;  %v2938_v15 = vld [vmem:[%s3223_s4 + $0x30] sm:$0xff]  }
 0x247   : > { %2752 = vmatmul.mubr.bf16.gmra.mrb[8].mxu0 %v1491_v53  ;;  %v1464_v48 = vadd.f32 %v1441_v9, %v1336_v23  ;;  %v2934_v53 = vld [vmem:[%s3223_s4 + $0x10] sm:$0xff]   ;;  %v2506_v17 = vld [vmem:[%s3655_s18] ss:$0 sm:$0xff] }
 0x248   : > { %v1467_v21 = vadd.f32 %v1447_v20, %v1339_v19  ;;  %v2500_v22 = vadd.f32 -0.6931472, %v1466_v16 }
 0x249   : > { %v2498_v43 = vadd.f32 -0.6931472, %v1464_v48  ;;  %2786 = vmatpush3.bf16.msra.mxu0 %v2933_v8 }
 0x24a   : > { %v2501_v24 = vadd.f32 -0.6931472, %v1467_v21  ;;  %2787 = vmatprep.subr.bf16.mxu0 %v3068_v3 }
 0x24b   : > { %v3003_v26 = vpop.eup %3002 }
 0x24c   : > { %v3005_v27 = vpop.eup %3004  ;;  %v1443_v30 = vmul.f32 0.6931472, %v3003_v26  ;;  %v1493_v32 = vpack.c.bf16 %v2501_v24, %v2500_v22 }
 0x24d   : > { %v3007_v7 = vpop.eup %3006  ;;  %v1453_v10 = vmul.f32 0.6931472, %v3005_v27  ;;  %2788 = vmatpush3.bf16.msra.mxu0 %v2934_v53 }
 0x24e   : > { %v3009_v35 = vpop.eup %3008  ;;  %v1465_v38 = vadd.f32 %v1443_v30, %v1337_v29  ;;  %v1449_v28 = vmul.f32 0.6931472, %v3007_v7  ;;  %2789 = vmatprep.subr.bf16.mxu0 %v3068_v3 }
 0x24f   : > { %v3011_v41 = vpop.eup %3010  ;;  %v1470_v11 = vadd.f32 %v1453_v10, %v1342_v33  ;;  %v1455_v42 = vmul.f32 0.6931472, %v3009_v35 }
 0x250   : > { %v2499_v25 = vadd.f32 -0.6931472, %v1465_v38  ;;  %v1468_v45 = vadd.f32 %v1449_v28, %v1340_v39  ;;  %v1451_v46 = vmul.f32 0.6931472, %v3011_v41 }
 0x251   : > { %v1471_v49 = vadd.f32 %v1455_v42, %v1343_v51  ;;  %v2504_v14 = vadd.f32 -0.6931472, %v1470_v11  ;;  %2790 = vmatpush3.bf16.msra.mxu0 %v2935_v12 }
 0x252   : > { %v1469_v36 = vadd.f32 %v1451_v46, %v1341_v31  ;;  %v1492_v34 = vpack.c.bf16 %v2499_v25, %v2498_v43  ;;  %v2502_v50 = vadd.f32 -0.6931472, %v1468_v45  ;;  %2791 = vmatprep.subr.bf16.mxu0 %v3068_v3 }
 0x253   : > { %v2505_v40 = vadd.f32 -0.6931472, %v1471_v49 }
 0x254   : > { %v2503_v52 = vadd.f32 -0.6931472, %v1469_v36  ;;  %2755 = vmatprep.mubr.bf16.mxu0 %v1492_v34 }
 0x255   : > { %2756 = vmatmul.mubr.bf16.gmra.mrb[12].mxu0 %v1493_v32  ;;  %v1495_v44 = vpack.c.bf16 %v2505_v40, %v2504_v14 }
 0x256   : > { %v1494_v18 = vpack.c.bf16 %v2503_v52, %v2502_v50  ;;  %2792 = vmatpush3.bf16.msra.mxu0 %v2936_v13 }
 0x257   : > { %2793 = vmatprep.subr.bf16.mxu0 %v3068_v3 }
 0x258   : > { %2759 = vmatprep.mubr.bf16.mxu0 %v1494_v18 }
 0x25a   : > { %2794 = vmatpush3.bf16.msra.mxu0 %v2937_v47 }
 0x25b   : > { %2795 = vmatprep.subr.bf16.mxu0 %v3068_v3 }
 0x25d   : > { %2760 = vmatmul.mubr.bf16.gmra.mrb[16].mxu0 %v1495_v44 }
 0x25e   : > { %2799 = vmatprep.mubr.msk.bf16.mxu0 %vm3069_vm0, %v3068_v3  ;;  %2796 = vmatpush3.bf16.msra.mxu0 %v2938_v15 }
 0x25f   : > { %2797 = vmatprep.subr.bf16.mxu0 %v3068_v3 }
 0x312   : > { %v2749_v16 = vpop.f32.mrb[4].mxu0 }
 0x313   : > { %v1610_v19 = vadd.f32 %v2749_v16, %v2506_v17  ;;  %v1601_v20 = vpop.f32.mrb[5].mxu0  ;;  %v2940_v16 = vld [vmem:[%s3232_s29] sm:$0xff]  }
 0x314   : > { %v1602_v9 = vadd.f32 %v2506_v17, %v1601_v20  ;;  %v2750_v21 = vpop.f32.mrb[6].mxu0  ;;  %v2942_v20 = vld [vmem:[%s3232_s29 + $0x10] sm:$0xff]  }
 0x315   : > { %v1666_v22 = vmul.f32 %v3343_v54, %v1610_v19  ;;  %v1613_v23 = vadd.f32 %v2750_v21, %v2506_v17  ;;  %v1604_v24 = vpop.f32.mrb[7].mxu0  ;;  %v2941_v19 = vld [vmem:[%s3232_s29 + $0x8] sm:$0xff]   ;;  %v2944_v21 = vld [vmem:[%s3232_s29 + $0x20] sm:$0xff]  }
 0x316   : > { %v1664_v26 = vmul.f32 %v1602_v9, %v3345_v55  ;;  %v1605_v27 = vadd.f32 %v2506_v17, %v1604_v24  ;;  %v2943_v9 = vld [vmem:[%s3232_s29 + $0x18] sm:$0xff]  }
 0x317   : > { %v1667_v48 = vmul.f32 %v3347_v56, %v1613_v23  ;;  %v2946_v23 = vld [vmem:[%s3232_s29 + $0x30] sm:$0xff]   ;;  %v2947_v24 = vld [vmem:[%s3232_s29 + $0x38] sm:$0xff]  }
 0x318   : > { %v1665_v29 = vmul.f32 %v1605_v27, %v3349_v57 }
 0x319   : > { %v1681_v30 = vpack.c.bf16 %v1667_v48, %v1666_v22  ;;  %v2945_v22 = vld [vmem:[%s3232_s29 + $0x28] sm:$0xff]  }
 0x31a   : > { %v1680_v32 = vpack.c.bf16 %v1665_v29, %v1664_v26  ;;  %v2753_v7 = vpop.f32.mrb[8].mxu0  ;;  %v2516_v26 = vld [vmem:[%s775_s6] ss:$0 sm:$0xff]  ;;  %s3656_s6 = sld [smem:[#allocation14_spill]] (%p2000_p6) }
 0x31b   : > { %v1626_v33 = vadd.f32 %v2753_v7, %v2506_v17  ;;  %v1617_v10 = vpop.f32.mrb[9].mxu0 }
 0x31c   : > { %v1618_v35 = vadd.f32 %v2506_v17, %v1617_v10  ;;  %v2754_v38 = vpop.f32.mrb[10].mxu0  ;;  %2764 = vmatpush3.bf16.msra.mxu1 %v1680_v32 }
 0x31d   : > { %v1670_v39 = vmul.f32 %v3351_v58, %v1626_v33  ;;  %v1629_v54 = vadd.f32 %v2754_v38, %v2506_v17  ;;  %v1620_v28 = vpop.f32.mrb[11].mxu0  ;;  %2765 = vmatprep.subr.bf16.mxu1 %v3068_v3 }
 0x31e   : > { %v1668_v55 = vmul.f32 %v1618_v35, %v3353_v59  ;;  %v1621_v41 = vadd.f32 %v2506_v17, %v1620_v28 }
 0x31f   : > { %v1671_v56 = vmul.f32 %v3355_v60, %v1629_v54 }
 0x320   : > { %v1669_v57 = vmul.f32 %v1621_v41, %v3357_v61  ;;  %2766 = vmatpush3.bf16.msra.mxu1 %v1681_v30 }
 0x321   : > { %v1683_v11 = vpack.c.bf16 %v1671_v56, %v1670_v39  ;;  %2767 = vmatprep.subr.bf16.mxu1 %v3068_v3 }
 0x322   : > { %v1682_v51 = vpack.c.bf16 %v1669_v57, %v1668_v55 }
 0x324   : > { %2768 = vmatpush3.bf16.msra.mxu1 %v1682_v51 }
 0x325   : > { %2769 = vmatprep.subr.bf16.mxu1 %v3068_v3 }
 0x328   : > { %v2757_v58 = vpop.f32.mrb[12].mxu0  ;;  %2770 = vmatpush3.bf16.msra.mxu1 %v1683_v11 }
 0x329   : > { %v1642_v42 = vadd.f32 %v2757_v58, %v2506_v17  ;;  %v1633_v31 = vpop.f32.mrb[13].mxu0  ;;  %2771 = vmatprep.subr.bf16.mxu1 %v3068_v3 }
 0x32a   : > { %v1634_v59 = vadd.f32 %v2506_v17, %v1633_v31  ;;  %v2758_v43 = vpop.f32.mrb[14].mxu0 }
 0x32b   : > { %v1674_v60 = vmul.f32 %v3359_v62, %v1642_v42  ;;  %v1645_v25 = vadd.f32 %v2758_v43, %v2506_v17  ;;  %v1636_v61 = vpop.f32.mrb[15].mxu0 }
 0x32c   : > { %v1672_v45 = vmul.f32 %v1634_v59, %v3361_v63  ;;  %v1637_v46 = vadd.f32 %v2506_v17, %v1636_v61  ;;  %v2527_v61 = vld [vmem:[%s783_s8] ss:$0 sm:$0xff] }
 0x32d   : > { %v1675_v49 = vmul.f32 %v3363_v0, %v1645_v25 }
 0x32e   : > { %v1673_v36 = vmul.f32 %v1637_v46, %v3365_v1  ;;  %v1994_v46 = vld [vmem:[#allocation2] sm:$0xff] }
 0x32f   : > { %v1685_v34 = vpack.c.bf16 %v1675_v49, %v1674_v60 }
 0x330   : > { %v1684_v14 = vpack.c.bf16 %v1673_v36, %v1672_v45  ;;  %v2761_v40 = vpop.f32.mrb[16].mxu0 }
 0x331   : > { %v1658_v50 = vadd.f32 %v2761_v40, %v2506_v17  ;;  %v1649_v52 = vpop.f32.mrb[17].mxu0 }
 0x332   : > { %v1650_v44 = vadd.f32 %v2506_v17, %v1649_v52  ;;  %v2762_v18 = vpop.f32.mrb[18].mxu0  ;;  %2772 = vmatpush3.bf16.msra.mxu1 %v1684_v14  ;;  %v1995_v14 = vld [vmem:[#allocation2 + $0x8] sm:$0xff] }
 0x333   : > { %v1678_v37 = vmul.f32 %v3367_v2, %v1658_v50  ;;  %v1661_v62 = vadd.f32 %v2762_v18, %v2506_v17  ;;  %v1652_v8 = vpop.f32.mrb[19].mxu0  ;;  %2773 = vmatprep.subr.bf16.mxu1 %v3068_v3  ;;  %v2931_v2 = vld [vmem:[%s3613_s3] sm:$0xff]  }
 0x334   : > { %v1676_v63 = vmul.f32 %v1650_v44, %v3369_v4  ;;  %v1653_v0 = vadd.f32 %v2506_v17, %v1652_v8  ;;  %v2939_v4 = vld [vmem:[%s3223_s4 + $0x38] sm:$0xff]   ;;  %v3020_v18 = vld [vmem:[%s3624_s14] sm:$0xff] (%p2000_p6)   ;;  %v3022_v8 = vld [vmem:[%s3624_s14 + $0x10] sm:$0xff] (%p2000_p6)  }
 0x335   : > { %v1679_v1 = vmul.f32 %v3371_v5, %v1661_v62  ;;  %2798 = vmatpush3.bf16.msra.mxu0 %v2939_v4  ;;  %v3021_v62 = vld [vmem:[%s3624_s14 + $0x8] sm:$0xff] (%p2000_p6)  }
 0x336   : > { %v1677_v53 = vmul.f32 %v1653_v0, %v3373_v6  ;;  %2774 = vmatpush3.bf16.msra.mxu1 %v1685_v34  ;;  %v3024_v0 = vld [vmem:[%s3624_s14 + $0x20] sm:$0xff] (%p2000_p6)  }
 0x337   : > { %v1687_v12 = vpack.c.bf16 %v1679_v1, %v1678_v37  ;;  %2775 = vmatprep.subr.bf16.mxu1 %v3068_v3  ;;  %v3070_v37 = vmov (%p2000_p6), 0.0   ;;  %v3025_v1 = vld [vmem:[%s3624_s14 + $0x28] sm:$0xff] (%p2000_p6)  }
 0x338   : > { %v1686_v13 = vpack.c.bf16 %v1677_v53, %v1676_v63  ;;  %2823 = vmatprep.subr.bf16.mxu0 (%p2000_p6), %v3070_v37  ;;  %v3023_v63 = vld [vmem:[%s3624_s14 + $0x18] sm:$0xff] (%p2000_p6)   ;;  %v3026_v53 = vld [vmem:[%s3624_s14 + $0x30] sm:$0xff] (%p2000_p6)  }
 0x33a   : > { %2776 = vmatpush3.bf16.msra.mxu1 %v1686_v13 }
 0x33b   : > { %2777 = vmatprep.subr.bf16.mxu1 %v3068_v3 }
 0x33e   : > { %2778 = vmatpush3.bf16.msra.mxu1 %v1687_v12  ;;  %v3027_v12 = vld [vmem:[%s3624_s14 + $0x38] sm:$0xff] (%p2000_p6)  }
 0x33f   : > { %2803 = vmatprep.subr.bf16.mxu1 %v3068_v3 }
 0x341   : > { %2780 = vmatmul.mubr.bf16.vlgmr.msra.gmra.mrb[32].mxu1 %v2931_v2 }
 0x342   : > { %2819 = vmatprep.mubr.msk.bf16.mxu1 %vm3069_vm0, %v3068_v3  ;;  %2804 = vmatpush3.bf16.msra.mxu1 %v2940_v16  ;;  %v3033_v16 = vld [vmem:[%s3626_s16 + $0x28] sm:$0xff] (%p2000_p6)  }
 0x343   : > { %2805 = vmatprep.subr.bf16.mxu1 %v3068_v3 }
 0x346   : > { %2806 = vmatpush3.bf16.msra.mxu1 %v2941_v19  ;;  %v3034_v19 = vld [vmem:[%s3626_s16 + $0x30] sm:$0xff] (%p2000_p6)  }
 0x347   : > { %2807 = vmatprep.subr.bf16.mxu1 %v3068_v3 }
 0x34a   : > { %2808 = vmatpush3.bf16.msra.mxu1 %v2942_v20  ;;  %v3035_v20 = vld [vmem:[%s3626_s16 + $0x38] sm:$0xff] (%p2000_p6)  }
 0x34b   : > { %2809 = vmatprep.subr.bf16.mxu1 %v3068_v3 }
 0x34e   : > { %2810 = vmatpush3.bf16.msra.mxu1 %v2943_v9  ;;  %v2537_v9 = vld [vmem:[%s3656_s6] ss:$0 sm:$0xff] (%p2000_p6) }
 0x34f   : > { %2811 = vmatprep.subr.bf16.mxu1 %v3068_v3 }
 0x352   : > { %2812 = vmatpush3.bf16.msra.mxu1 %v2944_v21 }
 0x353   : > { %2813 = vmatprep.subr.bf16.mxu1 %v3068_v3 }
 0x356   : > { %2814 = vmatpush3.bf16.msra.mxu1 %v2945_v22 }
 0x357   : > { %2815 = vmatprep.subr.bf16.mxu1 %v3068_v3 }
 0x35a   : > { %2816 = vmatpush3.bf16.msra.mxu1 %v2946_v23 }
 0x35b   : > { %2817 = vmatprep.subr.bf16.mxu1 %v3068_v3 }
 0x35e   : > { %2818 = vmatpush3.bf16.msra.mxu1 %v2947_v24 }
 0x35f   : > { %2843 = vmatprep.subr.bf16.mxu1 (%p2000_p6), %v3070_v37 }
 0x414   : > { %v1732_v5 = vpop.f32.mrb[32].mxu1 }
 0x415   : > { %v2781_v6 = vpop.f32.mrb[33].mxu1 }
 0x416   : > { %v1735_v47 = vpop.f32.mrb[34].mxu1  ;;  %v3029_v6 = vld [vmem:[%s3626_s16 + $0x8] sm:$0xff] (%p2000_p6)  }
 0x417   : > { %v1748_v15 = vpack.c.bf16 %v1735_v47, %v1732_v5  ;;  %v2782_v17 = vpop.f32.mrb[35].mxu1  ;;  %v3028_v5 = vld [vmem:[%s3626_s16] sm:$0xff] (%p2000_p6)   ;;  %v3030_v47 = vld [vmem:[%s3626_s16 + $0x10] sm:$0xff] (%p2000_p6)  }
 0x418   : > { %v3032_v17 = vld [vmem:[%s3626_s16 + $0x20] sm:$0xff] (%p2000_p6)  }
 0x419   : > { %2800 = vmatmul.mubr.bf16.vlgmr.msra.gmra.mrb[20].mxu0 %v1748_v15  ;;  %v3031_v15 = vld [vmem:[%s3626_s16 + $0x18] sm:$0xff] (%p2000_p6)  }
 0x41a   : > { %2824 = vmatpush3.bf16.msra.mxu0 (%p2000_p6), %v3020_v18  ;;  %2839 = vmatprep.mubr.msk.bf16.mxu0 (%p2000_p6), %vm3071_vm2, %v3070_v37 }
 0x41b   : > { %2825 = vmatprep.subr.bf16.mxu0 (%p2000_p6), %v3070_v37 }
 0x41e   : > { %2826 = vmatpush3.bf16.msra.mxu0 (%p2000_p6), %v3021_v62 }
 0x41f   : > { %2827 = vmatprep.subr.bf16.mxu0 (%p2000_p6), %v3070_v37 }
 0x422   : > { %2828 = vmatpush3.bf16.msra.mxu0 (%p2000_p6), %v3022_v8 }
 0x423   : > { %2829 = vmatprep.subr.bf16.mxu0 (%p2000_p6), %v3070_v37 }
 0x426   : > { %2830 = vmatpush3.bf16.msra.mxu0 (%p2000_p6), %v3023_v63 }
 0x427   : > { %2831 = vmatprep.subr.bf16.mxu0 (%p2000_p6), %v3070_v37 }
 0x42a   : > { %2832 = vmatpush3.bf16.msra.mxu0 (%p2000_p6), %v3024_v0 }
 0x42b   : > { %2833 = vmatprep.subr.bf16.mxu0 (%p2000_p6), %v3070_v37 }
 0x42e   : > { %2834 = vmatpush3.bf16.msra.mxu0 (%p2000_p6), %v3025_v1 }
 0x42f   : > { %2835 = vmatprep.subr.bf16.mxu0 (%p2000_p6), %v3070_v37 }
 0x432   : > { %2836 = vmatpush3.bf16.msra.mxu0 (%p2000_p6), %v3026_v53 }
 0x433   : > { %2837 = vmatprep.subr.bf16.mxu0 (%p2000_p6), %v3070_v37 }
 0x436   : > { %2838 = vmatpush3.bf16.msra.mxu0 (%p2000_p6), %v3027_v12 }
 0x4ec   : > { %v1854_v27 = vpop.f32.mrb[20].mxu0 }
 0x4ed   : > { %v1855_v48 = vadd.f32 %v2516_v26, %v1854_v27  ;;  %v2801_v29 = vpop.f32.mrb[21].mxu0 }
 0x4ee   : > { %v1857_v30 = vpop.f32.mrb[22].mxu0 }
 0x4ef   : > { %v1863_v32 = vand.u32 2147483647, %v1855_v48  ;;  %v1858_v7 = vadd.f32 %v2516_v26, %v1857_v30  ;;  %v2802_v33 = vpop.f32.mrb[23].mxu0  ;;  %v1861_v57 = vmax.f32 %v1855_v48, 0.0 }
 0x4f1   : > { %v1865_v10 = vsub.f32 0.0, %v1863_v32  ;;  %v1864_v35 = vand.u32 2147483647, %v1858_v7  ;;  %v1862_v42 = vmax.f32 %v1858_v7, 0.0 }
 0x4f3   : > { %v1867_v38 = vmul.f32 1.442695, %v1865_v10  ;;  %v1866_v39 = vsub.f32 0.0, %v1864_v35 }
 0x4f5   : > { %3012 = vpow2.f32 %v1867_v38  ;;  %v1869_v3 = vmul.f32 1.442695, %v1866_v39 }
 0x4f7   : > { %3014 = vpow2.f32 %v1869_v3 }
 0x4ff   : > { %v3013_v54 = vpop.eup %3012 }
 0x500   : > { %v1871_v28 = vadd.f32 1.0, %v3013_v54 }
 0x501   : > { %v3015_v55 = vpop.eup %3014 }
 0x502   : > { %3016 = vlog2.f32 %v1871_v28  ;;  %v1872_v41 = vadd.f32 1.0, %v3015_v55 }
 0x504   : > { %3018 = vlog2.f32 %v1872_v41 }
 0x50c   : > { %v3017_v56 = vpop.eup %3016 }
 0x50d   : > { %v1874_v11 = vmul.f32 0.6931472, %v3017_v56 }
 0x50e   : > { %v3019_v51 = vpop.eup %3018 }
 0x50f   : > { %v1877_v58 = vadd.f32 %v1874_v11, %v1861_v57  ;;  %v1876_v31 = vmul.f32 0.6931472, %v3019_v51 }
 0x511   : > { %v1878_v59 = vadd.f32 %v1876_v31, %v1862_v42  ;;  %v2525_v43 = vadd.f32 -0.6931472, %v1877_v58  ;;  %v2548_v31 = vld [vmem:[%s3657_s24] ss:$0 sm:$0xff] (%p2000_p6) }
 0x513   : > { %v2526_v60 = vadd.f32 -0.6931472, %v1878_v59 }
 0x515   : > { %v1881_v25 = vpack.c.bf16 %v2526_v60, %v2525_v43 }
 0x517   : > { %2820 = vmatmul.mubr.bf16.vlgmr.msra.gmra.mrb[36].mxu1 %v1881_v25 }
 0x518   : > { %2859 = vmatprep.mubr.msk.bf16.mxu1 (%p2000_p6), %vm3071_vm2, %v3070_v37  ;;  %2844 = vmatpush3.bf16.msra.mxu1 (%p2000_p6), %v3028_v5 }
 0x519   : > { %2845 = vmatprep.subr.bf16.mxu1 (%p2000_p6), %v3070_v37 }
 0x51c   : > { %2846 = vmatpush3.bf16.msra.mxu1 (%p2000_p6), %v3029_v6 }
 0x51d   : > { %2847 = vmatprep.subr.bf16.mxu1 (%p2000_p6), %v3070_v37 }
 0x520   : > { %2848 = vmatpush3.bf16.msra.mxu1 (%p2000_p6), %v3030_v47 }
 0x521   : > { %2849 = vmatprep.subr.bf16.mxu1 (%p2000_p6), %v3070_v37 }
 0x524   : > { %2850 = vmatpush3.bf16.msra.mxu1 (%p2000_p6), %v3031_v15 }
 0x525   : > { %2851 = vmatprep.subr.bf16.mxu1 (%p2000_p6), %v3070_v37 }
 0x528   : > { %2852 = vmatpush3.bf16.msra.mxu1 (%p2000_p6), %v3032_v17 }
 0x529   : > { %2853 = vmatprep.subr.bf16.mxu1 (%p2000_p6), %v3070_v37 }
 0x52c   : > { %2854 = vmatpush3.bf16.msra.mxu1 (%p2000_p6), %v3033_v16 }
 0x52d   : > { %2855 = vmatprep.subr.bf16.mxu1 (%p2000_p6), %v3070_v37 }
 0x530   : > { %2856 = vmatpush3.bf16.msra.mxu1 (%p2000_p6), %v3034_v19 }
 0x531   : > { %2857 = vmatprep.subr.bf16.mxu1 (%p2000_p6), %v3070_v37 }
 0x534   : > { %2858 = vmatpush3.bf16.msra.mxu1 (%p2000_p6), %v3035_v20 }
 0x5ea   : > { %v1987_v45 = vpop.f32.mrb[36].mxu1 }
 0x5eb   : > { %v1988_v49 = vadd.f32 %v2527_v61, %v1987_v45  ;;  %v2821_v36 = vpop.f32.mrb[37].mxu1  ;;  %2004 = sbr.rel (!%p2000_p6) target bundleno = 2002 (0x7d2), region = 108 }
 0x5ec   : > { %v1990_v34 = vpop.f32.mrb[38].mxu1 }
 0x5ed   : > { %v1996_v40 = vadd.f32 %v1994_v46, %v1988_v49  ;;  %v1991_v50 = vadd.f32 %v2527_v61, %v1990_v34  ;;  %v2822_v52 = vpop.f32.mrb[39].mxu1 }
 0x5ef   : > { %1998 = vst [vmem:[#allocation2] sm:$0xff] %v1996_v40  ;;  %v1997_v44 = vadd.f32 %v1995_v14, %v1991_v50 }
 0x5f1   : > { %1999 = vst [vmem:[#allocation2 + $0x8] sm:$0xff] %v1997_v44 }
 0x5f6   : > { %v2005_v13 = vld [vmem:[#allocation2] sm:$0xff] }
 0x5f8   : > { %v2006_v2 = vld [vmem:[#allocation2 + $0x8] sm:$0xff] }
 0x5f9   : > { %v2007_v4 = vpack.c.bf16 %v2006_v2, %v2005_v13 }
 0x5fb   : > { %2840 = vmatmul.mubr.bf16.vlgmr.msra.gmra.mrb[0].mxu0 %v2007_v4 }
 0x6ce   : > { %v2113_v21 = vpop.f32.mrb[0].mxu0 }
 0x6cf   : > { %v2114_v22 = vadd.f32 %v2537_v9, %v2113_v21  ;;  %v2841_v23 = vpop.f32.mrb[1].mxu0 }
 0x6d0   : > { %v2116_v24 = vpop.f32.mrb[2].mxu0 }
 0x6d1   : > { %v2122_v26 = vand.u32 2147483647, %v2114_v22  ;;  %v2117_v27 = vadd.f32 %v2537_v9, %v2116_v24  ;;  %v2842_v48 = vpop.f32.mrb[3].mxu0  ;;  %v2120_v54 = vmax.f32 %v2114_v22, 0.0 }
 0x6d3   : > { %v2124_v29 = vsub.f32 0.0, %v2122_v26  ;;  %v2123_v30 = vand.u32 2147483647, %v2117_v27  ;;  %v2121_v56 = vmax.f32 %v2117_v27, 0.0 }
 0x6d5   : > { %v2126_v32 = vmul.f32 1.442695, %v2124_v29  ;;  %v2125_v7 = vsub.f32 0.0, %v2123_v30 }
 0x6d7   : > { %3036 = vpow2.f32 %v2126_v32  ;;  %v2128_v33 = vmul.f32 1.442695, %v2125_v7 }
 0x6d9   : > { %3038 = vpow2.f32 %v2128_v33 }
 0x6e1   : > { %v3037_v10 = vpop.eup %3036 }
 0x6e2   : > { %v2130_v35 = vadd.f32 1.0, %v3037_v10 }
 0x6e3   : > { %v3039_v38 = vpop.eup %3038 }
 0x6e4   : > { %3040 = vlog2.f32 %v2130_v35  ;;  %v2131_v39 = vadd.f32 1.0, %v3039_v38 }
 0x6e6   : > { %3042 = vlog2.f32 %v2131_v39 }
 0x6ee   : > { %v3041_v3 = vpop.eup %3040 }
 0x6ef   : > { %v2133_v28 = vmul.f32 0.6931472, %v3041_v3 }
 0x6f0   : > { %v3043_v55 = vpop.eup %3042 }
 0x6f1   : > { %v2136_v41 = vadd.f32 %v2133_v28, %v2120_v54  ;;  %v2135_v57 = vmul.f32 0.6931472, %v3043_v55 }
 0x6f3   : > { %v2137_v11 = vadd.f32 %v2135_v57, %v2121_v56  ;;  %v2546_v51 = vadd.f32 -0.6931472, %v2136_v41 }
 0x6f5   : > { %v2547_v58 = vadd.f32 -0.6931472, %v2137_v11 }
 0x6f7   : > { %v2140_v42 = vpack.c.bf16 %v2547_v58, %v2546_v51 }
 0x6f9   : > { %2860 = vmatmul.mubr.bf16.vlgmr.msra.gmra.mrb[0].mxu1 %v2140_v42 }
 0x7cc   : > { %v2246_v59 = vpop.f32.mrb[0].mxu1 }
 0x7cd   : > { %v2247_v43 = vadd.f32 %v2548_v31, %v2246_v59  ;;  %v2861_v60 = vpop.f32.mrb[1].mxu1 }
 0x7ce   : > { %v2249_v25 = vpop.f32.mrb[2].mxu1 }
 0x7cf   : > { %2253 = vst [vmem:[%s3658_s28] sm:$0xff] %v2247_v43  ;;  %v2250_v61 = vadd.f32 %v2548_v31, %v2249_v25  ;;  %v2862_v45 = vpop.f32.mrb[3].mxu1 }
 0x7d1   : > { %2254 = vst [vmem:[%s3659_s15 + $0x8] sm:$0xff] %v2250_v61 }
 0x7d2 PF: > { %s3660_s26 = sld [smem:[#allocation6_spill]]  ;;  %s3661_s27 = sld [smem:[#allocation5_spill]] }
 0x7d3   : > { %s3662_s28 = sld [smem:[#allocation7_spill]] }
 0x7d8   : > { %s28_s29 = sadd.s32 1, %s3660_s26  }
 0x7d9   : > { %p25_p7 = scmp.ge.s32.totalorder %s28_s29, 4  }
 0x7db   :  { %27 = sbr.rel (!%p25_p7) target bundleno = 10 (0xa), region = 170 }

</bundles_post_ra>
